<compile_context>
chip_gen: v7x
topology: tpu7x:2x2x1
jax: 0.10.0
libtpu: 0.0.40
codegen_flags: <defaults>
</compile_context>

<pallas_src>
import functools
import math

import jax
import jax.numpy as jnp
from jax.experimental import pallas as pl
from jax.experimental.pallas import tpu as pltpu


# ---------------------------------------------------------------------------
# Tiled linear (fused QKV projection)
# ---------------------------------------------------------------------------
def _linear_kernel_acc(x_ref, w_ref, b_ref, o_ref, acc_ref):
    k = pl.program_id(2)

    @pl.when(k == 0)
    def _():
        acc_ref[...] = jnp.zeros_like(acc_ref)

    acc_ref[...] += jnp.dot(x_ref[...], w_ref[...],
                            preferred_element_type=jnp.float32)

    @pl.when(k == pl.num_programs(2) - 1)
    def _():
        o_ref[...] = (acc_ref[...] + b_ref[...].astype(jnp.float32)).astype(o_ref.dtype)


def _linear_kernel_single(x_ref, w_ref, b_ref, o_ref):
    # Single reduction step (K <= tk): no f32 scratch, no init/finalize phases.
    acc = jnp.dot(x_ref[...], w_ref[...], preferred_element_type=jnp.float32)
    o_ref[...] = (acc + b_ref[...].astype(jnp.float32)).astype(o_ref.dtype)


def _pick_tile(dim, candidates):
    # NOTE: falls back to the full dimension when nothing divides. Shapes used in
    # this script always divide, so the fallback never blows the VMEM budget.
    for t in candidates:
        if t <= dim and dim % t == 0:
            return t
    return dim


def pallas_linear(x2d, w, b, out_dtype=None):
    M, K = x2d.shape
    _, N = w.shape
    if out_dtype is None:
        out_dtype = x2d.dtype
    tm = _pick_tile(M, (512, 256, 128, 64, 32, 16, 8))
    tn = _pick_tile(N, (512, 384, 256, 128))   # lane-dense output tiles
    tk = _pick_tile(K, (512, 256, 128, 64))
    gm, gn, gk = M // tm, N // tn, K // tk

    if gk == 1:
        grid = (gm, gn)
        in_specs = [
            pl.BlockSpec((tm, K), lambda i, j: (i, 0)),
            pl.BlockSpec((K, tn), lambda i, j: (0, j)),
            pl.BlockSpec((1, tn), lambda i, j: (0, j)),
        ]
        out_spec = pl.BlockSpec((tm, tn), lambda i, j: (i, j))
        kernel, scratch = _linear_kernel_single, []
        dims = ("parallel", "parallel")
    else:
        grid = (gm, gn, gk)
        in_specs = [
            pl.BlockSpec((tm, tk), lambda i, j, k: (i, k)),
            pl.BlockSpec((tk, tn), lambda i, j, k: (k, j)),
            pl.BlockSpec((1, tn), lambda i, j, k: (0, j)),
        ]
        out_spec = pl.BlockSpec((tm, tn), lambda i, j, k: (i, j))
        kernel, scratch = _linear_kernel_acc, [pltpu.VMEM((tm, tn), jnp.float32)]
        dims = ("parallel", "parallel", "arbitrary")

    return pl.pallas_call(
        kernel,
        out_shape=jax.ShapeDtypeStruct((M, N), out_dtype),
        grid=grid,
        in_specs=in_specs,
        out_specs=out_spec,
        scratch_shapes=scratch,
        compiler_params=pltpu.CompilerParams(
            dimension_semantics=dims,
            vmem_limit_bytes=48 * 1024 * 1024),
    )(x2d, w, b.reshape(1, N))


# ---------------------------------------------------------------------------
# Fused generalized attention + output projection (two-phase streaming kernel)
# ---------------------------------------------------------------------------
def _gelu_exact(x):
    # Matches torch.nn.GELU() (erf form).
    return 0.5 * x * (1.0 + jax.lax.erf(x * (1.0 / math.sqrt(2.0))))


def _attn_outproj_kernel(q_ref, k_ref, v_ref, projT_ref, mask_ref, wo_ref, bo_ref,
                         o_ref, ctx_acc, ksum_acc, *, eps, approx_recip):
    phase = pl.program_id(1)   # 0: accumulate ctx / k_sum over KV tiles; 1: Q tiles
    t = pl.program_id(2)
    cdt = q_ref.dtype          # MXU operand dtype (bf16 perf path or f32 check path)

    @pl.when(jnp.logical_and(phase == 0, t == 0))
    def _():
        ctx_acc[...] = jnp.zeros_like(ctx_acc)
        ksum_acc[...] = jnp.zeros_like(ksum_acc)

    @pl.when(phase == 0)
    def _():
        # Per-head feature map for all heads in one lane-dense matmul (block-diag projT).
        k_feat = jnp.dot(k_ref[...], projT_ref[...],
                         preferred_element_type=jnp.float32)          # (tn, HF)
        k_p = _gelu_exact(k_feat) + eps
        ksum_acc[...] += jnp.sum(k_p, axis=0, keepdims=True)          # (1, HF)
        # ctx += k_p^T @ v : contract over the sequence axis without a transpose.
        ctx_acc[...] += jax.lax.dot_general(
            k_p.astype(cdt), v_ref[...], (((0,), (0,)), ((), ())),
            preferred_element_type=jnp.float32)                       # (HF, inner)

    @pl.when(phase == 1)
    def _():
        q_feat = jnp.dot(q_ref[...], projT_ref[...],
                         preferred_element_type=jnp.float32)          # (tn, HF)
        q_p = _gelu_exact(q_feat) + eps
        mask = mask_ref[...].astype(jnp.float32)                      # (HF, inner) 0/1
        # Per-head denominator, broadcast over that head's Dh output columns.
        denom = jnp.dot((q_p * ksum_acc[...]).astype(cdt), mask.astype(cdt),
                        preferred_element_type=jnp.float32)           # (tn, inner)
        out_num = jnp.dot(q_p.astype(cdt), (ctx_acc[...] * mask).astype(cdt),
                          preferred_element_type=jnp.float32)         # (tn, inner)
        attn = out_num * pl.reciprocal(denom, approx=approx_recip)
        # Fused output projection (to_out), lane-dense padded output columns.
        out = jnp.dot(attn.astype(cdt), wo_ref[...],
                      preferred_element_type=jnp.float32) + bo_ref[...].astype(jnp.float32)
        o_ref[...] = out.astype(o_ref.dtype)


def pallas_attention_outproj(qkv, projT_block, head_mask, wo_pad, bo_pad, *,
                             heads, dim_head, num_feat, seq_tile=128,
                             eps=1e-6, approx_recip=True, out_dtype=None):
    B, N, C3 = qkv.shape
    inner = heads * dim_head
    HF = heads * num_feat
    dim_p = wo_pad.shape[1]
    if out_dtype is None:
        out_dtype = qkv.dtype
    tn = seq_tile if (N >= seq_tile and N % seq_tile == 0) else N
    NT = N // tn

    kernel = functools.partial(_attn_outproj_kernel, eps=eps,
                               approx_recip=approx_recip)

    # qkv is passed three times; index maps select lane-block 0/1/2 (q/k/v), so the
    # pipeline DMAs exactly the (tn, inner) tiles each phase needs (no slab slices).
    # Phase-dependent tile index pins the unused operand to tile 0.
    # TODO(synk): optionally sweep pipeline_mode=pl.Buffered(3) on q/k/v specs.
    in_specs = [
        pl.BlockSpec((None, tn, inner), lambda b, p, t: (b, p * t, 0)),        # q
        pl.BlockSpec((None, tn, inner), lambda b, p, t: (b, (1 - p) * t, 1)),  # k
        pl.BlockSpec((None, tn, inner), lambda b, p, t: (b, (1 - p) * t, 2)),  # v
        pl.BlockSpec((inner, HF), lambda b, p, t: (0, 0)),                     # projT
        pl.BlockSpec((HF, inner), lambda b, p, t: (0, 0)),                     # head mask
        pl.BlockSpec((inner, dim_p), lambda b, p, t: (0, 0)),                  # wo (padded)
        pl.BlockSpec((1, dim_p), lambda b, p, t: (0, 0)),                      # bo (padded)
    ]
    out_spec = pl.BlockSpec((None, tn, dim_p), lambda b, p, t: (b, p * t, 0))

    return pl.pallas_call(
        kernel,
        out_shape=jax.ShapeDtypeStruct((B, N, dim_p), out_dtype),
        grid=(B, 2, NT),
        in_specs=in_specs,
        out_specs=out_spec,
        scratch_shapes=[pltpu.VMEM((HF, inner), jnp.float32),   # ctx accumulator
                        pltpu.VMEM((1, HF), jnp.float32)],       # k_sum accumulator
        compiler_params=pltpu.CompilerParams(
            dimension_semantics=("parallel", "arbitrary", "arbitrary"),
            vmem_limit_bytes=48 * 1024 * 1024),
    )(qkv, qkv, qkv, projT_block, head_mask, wo_pad, bo_pad)


# ---------------------------------------------------------------------------
# Parameter construction (deterministic, synthetic). Fused / derived constants
# (w_qkv, b_qkv, projT_block, head_mask, padded to_out weights) are precomputed
# here so nothing is rebuilt per forward call.
# ---------------------------------------------------------------------------
def orthogonal_gaussian_matrix(key, num_rows, num_cols):
    num_blocks = num_rows // num_cols
    keys = jax.random.split(key, num_blocks + 2)
    blocks = []
    for i in range(num_blocks):
        block = jax.random.normal(keys[i], (num_cols, num_cols), jnp.float32)
        qm, _ = jnp.linalg.qr(block)
        blocks.append(qm.T)
    remaining = num_rows - num_blocks * num_cols
    if remaining > 0:
        block = jax.random.normal(keys[num_blocks], (num_cols, num_cols), jnp.float32)
        qm, _ = jnp.linalg.qr(block)
        blocks.append(qm.T[:remaining])
    matrix = jnp.concatenate(blocks, axis=0)
    multiplier = jax.random.normal(keys[-1], (num_rows,), jnp.float32)
    return multiplier[:, None] * matrix  # == diag(multiplier) @ matrix


def init_self_attention_params(key, dim, heads=2, dim_head=64):
    inner = heads * dim_head
    num_feat = dim_head                       # GeneralizedAttention(head_dims, head_dims)
    HF = heads * num_feat
    ks = jax.random.split(key, 9)
    scale_in = 1.0 / math.sqrt(dim)
    scale_inner = 1.0 / math.sqrt(inner)

    wq = jax.random.normal(ks[0], (dim, inner), jnp.float32) * scale_in
    bq = jax.random.normal(ks[1], (inner,), jnp.float32) * 0.01
    wk = jax.random.normal(ks[2], (dim, inner), jnp.float32) * scale_in
    bk = jax.random.normal(ks[3], (inner,), jnp.float32) * 0.01
    wv = jax.random.normal(ks[4], (dim, inner), jnp.float32) * scale_in
    bv = jax.random.normal(ks[5], (inner,), jnp.float32) * 0.01
    wo = jax.random.normal(ks[6], (inner, dim), jnp.float32) * scale_inner
    bo = jax.random.normal(ks[7], (dim,), jnp.float32) * 0.01
    proj_mat = orthogonal_gaussian_matrix(ks[8], num_feat, dim_head)

    # Fused / derived constants (precomputed once, not per forward call).
    w_qkv = jnp.concatenate([wq, wk, wv], axis=1)                     # (dim, 3*inner)
    b_qkv = jnp.concatenate([bq, bk, bv], axis=0)                     # (3*inner,)
    projT_block = jnp.kron(jnp.eye(heads, dtype=jnp.float32), proj_mat.T)  # (inner, HF)
    row_h = (jnp.arange(HF) // num_feat)[:, None]
    col_h = (jnp.arange(inner) // dim_head)[None, :]
    head_mask = (row_h == col_h).astype(jnp.float32)                  # (HF, inner)
    dim_p = ((dim + 127) // 128) * 128                                # lane-dense out
    wo_pad = jnp.zeros((inner, dim_p), jnp.float32).at[:, :dim].set(wo)
    bo_pad = jnp.zeros((1, dim_p), jnp.float32).at[0, :dim].set(bo)

    return {
        "heads": heads, "dim_head": dim_head, "num_features": num_feat, "dim": dim,
        "wq": wq, "bq": bq, "wk": wk, "bk": bk, "wv": wv, "bv": bv,
        "wo": wo, "bo": bo, "proj_mat": proj_mat,
        "w_qkv": w_qkv, "b_qkv": b_qkv, "projT_block": projT_block,
        "head_mask": head_mask, "wo_pad": wo_pad, "bo_pad": bo_pad,
    }


# ---------------------------------------------------------------------------
# Forward pass (two pallas_calls; no HBM transposes / head rearranges)
# ---------------------------------------------------------------------------
def self_attention_forward(params, x, compute_dtype=jnp.bfloat16,
                           approx_recip=None, seq_tile=128):
    b, n, dim = x.shape
    h, dh = params["heads"], params["dim_head"]
    inner = h * dh
    num_feat = params["num_features"]
    if approx_recip is None:
        approx_recip = (jnp.dtype(compute_dtype) == jnp.dtype(jnp.bfloat16))

    # Fused QKV projection (bf16 operands / f32 accumulation on the perf path).
    xc = x.astype(compute_dtype)
    qkv = pallas_linear(xc.reshape(b * n, dim),
                        params["w_qkv"].astype(compute_dtype),
                        params["b_qkv"],
                        out_dtype=compute_dtype)          # (b*n, 3*inner)
    qkv = qkv.reshape(b, n, 3 * inner)                    # metadata-only reshape

    out_p = pallas_attention_outproj(
        qkv,
        params["projT_block"].astype(compute_dtype),
        params["head_mask"].astype(compute_dtype),
        params["wo_pad"].astype(compute_dtype),
        params["bo_pad"],
        heads=h, dim_head=dh, num_feat=num_feat, seq_tile=seq_tile,
        approx_recip=approx_recip, out_dtype=x.dtype)     # (b, n, dim_p)
    if out_p.shape[-1] != dim:
        out_p = out_p[:, :, :dim]
    return out_p                                          # (b, n, dim)


# ---------------------------------------------------------------------------
# Pure-JAX reference (correctness check only)
# ---------------------------------------------------------------------------
def _reference_forward(params, x):
    b, n, dim = x.shape
    h, dh = params["heads"], params["dim_head"]
    q = x @ params["wq"] + params["bq"]
    k = x @ params["wk"] + params["bk"]
    v = x @ params["wv"] + params["bv"]

    def split_heads(y):
        return y.reshape(b, n, h, dh).transpose(0, 2, 1, 3)

    q, k, v = map(split_heads, (q, k, v))
    proj = params["proj_mat"]

    def feat(y):
        d = y @ proj.T
        return 0.5 * d * (1.0 + jax.lax.erf(d / math.sqrt(2.0))) + 1e-6

    qp, kp = feat(q), feat(k)
    k_sum = kp.sum(axis=-2)
    d_inv = 1.0 / jnp.einsum("bhnd,bhd->bhn", qp, k_sum)
    contexts = jnp.einsum("bhnd,bhne->bhde", kp, v)
    out = jnp.einsum("bhde,bhnd,bhn->bhne", contexts, qp, d_inv)
    out = out.transpose(0, 2, 1, 3).reshape(b, n, h * dh)
    return out @ params["wo"] + params["bo"]


if __name__ == "__main__":
    key = jax.random.PRNGKey(0)
    kx, kp = jax.random.split(key)

    B, N, DIM = 2, 256, 32   # heads=2, dim_head=64 -> inner_dim=128; N tiled by 128
    params = init_self_attention_params(kp, DIM, heads=2, dim_head=64)
    x = jax.random.normal(kx, (B, N, DIM), jnp.float32)

    ref = jax.block_until_ready(_reference_forward(params, x))

    # Strict numerics path: f32 operands, exact reciprocal -> validates the algebra.
    out_f32 = jax.block_until_ready(
        self_attention_forward(params, x, compute_dtype=jnp.float32,
                               approx_recip=False))
    assert out_f32.shape == (B, N, DIM)
    assert jnp.allclose(out_f32, ref, atol=1e-3, rtol=1e-3), "f32 mismatch vs reference"

    # Performance path: bf16 qkv intermediate / bf16 MXU operands, EUP reciprocal.
    out_bf16 = jax.block_until_ready(self_attention_forward(params, x))
    assert out_bf16.shape == (B, N, DIM)
    assert jnp.allclose(out_bf16, ref, atol=1e-1, rtol=1e-1), "bf16 mismatch vs reference"

    print("KERNEL_OK")
</pallas_src>

<mosaic_0001>
module attributes {stable_mosaic.version = 11 : i64} {
  func.func @_linear_kernel_single(%arg0: i32, %arg1: i32, %arg2: memref<512x32xf32, #tpu.memory_space<vmem>>, %arg3: memref<32x384xf32, #tpu.memory_space<vmem>>, %arg4: memref<1x384xf32, #tpu.memory_space<vmem>>, %arg5: memref<512x384xf32, #tpu.memory_space<vmem>>) attributes {dimension_semantics = [#tpu.dimension_semantics<parallel>, #tpu.dimension_semantics<parallel>], iteration_bounds = array<i64: 1, 1>, scalar_prefetch = 0 : i64, scratch_operands = 0 : i64, tpu.core_type = #tpu.core_type<tc>, window_params = [{transform_indices = @transform_0, window_bounds = array<i64: 512, 32>}, {transform_indices = @transform_1, window_bounds = array<i64: 32, 384>}, {transform_indices = @transform_2, window_bounds = array<i64: 1, 384>}, {transform_indices = @transform_3, window_bounds = array<i64: 512, 384>}]} {
    %c0 = arith.constant 0 : index
    %c0_0 = arith.constant 0 : index
    %0 = vector.load %arg2[%c0, %c0_0] : memref<512x32xf32, #tpu.memory_space<vmem>>, vector<512x32xf32>
    %c0_1 = arith.constant 0 : index
    %c0_2 = arith.constant 0 : index
    %1 = vector.load %arg3[%c0_1, %c0_2] : memref<32x384xf32, #tpu.memory_space<vmem>>, vector<32x384xf32>
    %cst = arith.constant dense<0.000000e+00> : vector<512x384xf32>
    %2 = tpu.matmul %0, %1, %cst {dimension_numbers = #tpu.dot_dimension_numbers<[1], [0], [0], [1], [0, 0, 1, 1], [], []>} : vector<512x32xf32>, vector<32x384xf32>, vector<512x384xf32> -> vector<512x384xf32>
    %c0_3 = arith.constant 0 : index
    %c0_4 = arith.constant 0 : index
    %3 = vector.load %arg4[%c0_3, %c0_4] : memref<1x384xf32, #tpu.memory_space<vmem>>, vector<1x384xf32>
    %4 = vector.broadcast %3 : vector<1x384xf32> to vector<512x384xf32>
    %5 = arith.addf %2, %4 : vector<512x384xf32>
    %c0_5 = arith.constant 0 : index
    %c0_6 = arith.constant 0 : index
    %6 = vector.load %arg5[%c0_5, %c0_6] : memref<512x384xf32, #tpu.memory_space<vmem>>, vector<512x384xf32>
    tpu.vector_store %arg5[%c0_5, %c0_6], %5 {strides = array<i32>} : memref<512x384xf32, #tpu.memory_space<vmem>>, vector<512x384xf32>,
    return
  }
  func.func @transform_0(%arg0: i32, %arg1: i32) -> (i32, i32) {
    %c0_i32 = arith.constant 0 : i32
    %c0_i32_0 = arith.constant 0 : i32
    return %arg0, %c0_i32 : i32, i32
  }
  func.func @transform_1(%arg0: i32, %arg1: i32) -> (i32, i32) {
    %c0_i32 = arith.constant 0 : i32
    %c0_i32_0 = arith.constant 0 : i32
    return %c0_i32, %arg1 : i32, i32
  }
  func.func @transform_2(%arg0: i32, %arg1: i32) -> (i32, i32) {
    %c0_i32 = arith.constant 0 : i32
    %c0_i32_0 = arith.constant 0 : i32
    return %c0_i32, %arg1 : i32, i32
  }
  func.func @transform_3(%arg0: i32, %arg1: i32) -> (i32, i32) {
    %c0_i32 = arith.constant 0 : i32
    return %arg0, %arg1 : i32, i32
  }
}

</mosaic_0001>

<bundles_post_ra>
// kernel: tpu_custom_call.1
= control target key start
LH: loop header
LB: loop body
LE: loop exit
PB: predicated region body
PF: predicated region fallthrough
CT: control target
= control target key end

     0   :  { %v1691_v7 = vmov 0.0   ;;  %vm108_vm0 = vcmask 261120   ;;  %s2452_s0 = inlined_call_operand.vmem [shape: f32[512,32], index: 0, kind: input, shape index: {}]   ;;  %s2453_s1 = inlined_call_operand.vmem [shape: f32[32,384], index: 1, kind: input, shape index: {}]   ;;  %s2454_s2 = inlined_call_operand.vmem [shape: f32[1,384], index: 2, kind: input, shape index: {}]   ;;  %s2455_s3 = inlined_call_operand.hbm [shape: f32[512,384], index: 3, kind: output, shape index: {}]  }
   0x1   :  { %v80_v0 = vld [vmem:[%s2453_s1 + $0x8] sm:$0xff]  ;;  %v83_v1 = vld [vmem:[%s2453_s1 + $0x20] sm:$0xff]  ;;  %v82_v4 = vld [vmem:[%s2453_s1 + $0x18] sm:$0xff]  ;;  %365 = vmatprep.mubr.f32.mxu0 %v1691_v7  ;;  %653 = vmatprep.mubr.f32.mxu1 %v1691_v7 }
   0x2   :  { %v79_v2 = vld [vmem:[%s2453_s1] sm:$0xff]  ;;  %v1643_v3 = vpack.c.bf16 %v83_v1, %v80_v0  ;;  %v86_v5 = vld [vmem:[%s2453_s1 + $0x38] sm:$0xff]  ;;  %v89_v6 = vld [vmem:[%s2453_s1 + $0x50] sm:$0xff] }
   0x3   :  { %v1645_v8 = vpack.c.bf16 %v82_v4, %v79_v2  ;;  %v1647_v9 = vpack.c.bf16 %v89_v6, %v86_v5  ;;  %v85_v10 = vld [vmem:[%s2453_s1 + $0x30] sm:$0xff]  ;;  %v88_v11 = vld [vmem:[%s2453_s1 + $0x48] sm:$0xff]  ;;  %v1750_v16 = vld [vmem:[%s2452_s0] sm:$0xff] }
   0x4   :  { %1644 = vmatprep.subr.bf16.mxu0 %v1643_v3  ;;  %1659 = vmatprep.subr.bf16.mxu1 %v1643_v3  ;;  %v81_v12 = vld [vmem:[%s2453_s1 + $0x10] sm:$0xff]  ;;  %v84_v13 = vld [vmem:[%s2453_s1 + $0x28] sm:$0xff]  ;;  %v1649_v14 = vpack.c.bf16 %v88_v11, %v85_v10  ;;  %v1755_v17 = vld [vmem:[%s2452_s0 + $0x180] sm:$0xff] }
   0x5   :  { %1646 = vmatpush1.bf16.msra.mxu0 %v1645_v8  ;;  %1661 = vmatpush1.bf16.msra.mxu1 %v1645_v8  ;;  %v1651_v15 = vpack.c.bf16 %v84_v13, %v81_v12  ;;  %v87_v18 = vld [vmem:[%s2453_s1 + $0x40] sm:$0xff]  ;;  %v90_v19 = vld [vmem:[%s2453_s1 + $0x58] sm:$0xff]  ;;  %v1771_v21 = vld [vmem:[%s2452_s0 + $0x8] sm:$0xff] }
   0x6   :  { %1648 = vmatprep.subr.bf16.mxu0 %v1647_v9  ;;  %1660 = vmatprep.subr.bf16.mxu1 %v1647_v9  ;;  %v1655_v20 = vpack.c.bf16 %v90_v19, %v87_v18  ;;  %v1776_v22 = vld [vmem:[%s2452_s0 + $0x188] sm:$0xff]  ;;  %v1788_v23 = vld [vmem:[%s2452_s0 + $0x10] sm:$0xff]  ;;  %v1804_v25 = vld [vmem:[%s2452_s0 + $0x18] sm:$0xff] }
   0x7   :  { %v1793_v24 = vld [vmem:[%s2452_s0 + $0x190] sm:$0xff]  ;;  %v1809_v26 = vld [vmem:[%s2452_s0 + $0x198] sm:$0xff] }
   0x9   :  { %1650 = vmatpush1.bf16.msra.mxu0 %v1649_v14  ;;  %1662 = vmatpush1.bf16.msra.mxu1 %v1649_v14 }
   0xa   :  { %1652 = vmatprep.subr.bf16.mxu1 %v1651_v15 }
   0xc   :  { %1343 = vmatmul.mubr.msk.f32.vlgmr.msra.gmra.mrb[0].mxu0 %vm108_vm0, %v1750_v16  ;;  %1391 = vmatmul.mubr.msk.f32.vlgmr.msra.gmra.mrb[0].mxu1 %vm108_vm0, %v1755_v17 }
   0xd   :  { %1654 = vmatpush3.bf16.msra.mxu1 %v1651_v15  ;;  %371 = vmatprep.mubr.f32.mxu0 %v1691_v7 }
   0xe   :  { %659 = vmatprep.mubr.f32.mxu1 %v1691_v7  ;;  %1656 = vmatprep.subr.bf16.mxu1 %v1655_v20 }
  0x10   :  { %1344 = vmatmul.mubr.msk.f32.gmra.mrb[2].mxu0 %vm108_vm0, %v1771_v21  ;;  %1392 = vmatmul.mubr.msk.f32.gmra.mrb[2].mxu1 %vm108_vm0, %v1776_v22 }
  0x11   :  { %377 = vmatprep.mubr.f32.mxu0 %v1691_v7  ;;  %665 = vmatprep.mubr.f32.mxu1 %v1691_v7 }
  0x12   :  { %1658 = vmatpush3.bf16.msra.mxu1 %v1655_v20 }
  0x14   :  { %1345 = vmatmul.mubr.msk.f32.gmra.mrb[4].mxu0 %vm108_vm0, %v1788_v23  ;;  %1393 = vmatmul.mubr.msk.f32.gmra.mrb[4].mxu1 %vm108_vm0, %v1793_v24 }
  0x15   :  { %383 = vmatprep.mubr.f32.mxu0 %v1691_v7  ;;  %671 = vmatprep.mubr.f32.mxu1 %v1691_v7 }
  0x16   :  { %8 = vsyncpa [#allocation3], 0  ;;  %v1820_v27 = vld [vmem:[%s2452_s0 + $0x20] sm:$0xff]  ;;  %v1836_v29 = vld [vmem:[%s2452_s0 + $0x28] sm:$0xff]  ;;  %v93_v13 = vlaneseq }
  0x17   :  { %v1825_v28 = vld [vmem:[%s2452_s0 + $0x1a0] sm:$0xff]  ;;  %v1841_v30 = vld [vmem:[%s2452_s0 + $0x1a8] sm:$0xff]  ;;  %v1852_v31 = vld [vmem:[%s2452_s0 + $0x30] sm:$0xff] }
  0x18   :  { %1346 = vmatmul.mubr.msk.f32.gmra.mrb[6].mxu0 %vm108_vm0, %v1804_v25  ;;  %1394 = vmatmul.mubr.msk.f32.gmra.mrb[6].mxu1 %vm108_vm0, %v1809_v26  ;;  %v1857_v32 = vld [vmem:[%s2452_s0 + $0x1b0] sm:$0xff]  ;;  %v1868_v33 = vld [vmem:[%s2452_s0 + $0x38] sm:$0xff]  ;;  %v1884_v35 = vld [vmem:[%s2452_s0 + $0x40] sm:$0xff] }
  0x19   :  { %389 = vmatprep.mubr.f32.mxu0 %v1691_v7  ;;  %677 = vmatprep.mubr.f32.mxu1 %v1691_v7  ;;  %v1873_v34 = vld [vmem:[%s2452_s0 + $0x1b8] sm:$0xff]  ;;  %v1889_v36 = vld [vmem:[%s2452_s0 + $0x1c0] sm:$0xff]  ;;  %v1900_v37 = vld [vmem:[%s2452_s0 + $0x48] sm:$0xff] }
  0x1a   :  { %v1905_v38 = vld [vmem:[%s2452_s0 + $0x1c8] sm:$0xff]  ;;  %v25_v39 = vld [vmem:[%s2452_s0 + $0x50] sm:$0xff]  ;;  %v26_v41 = vld [vmem:[%s2452_s0 + $0x58] sm:$0xff] }
  0x1b   :  { %v1919_v40 = vld [vmem:[%s2452_s0 + $0x1d0] sm:$0xff]  ;;  %v1932_v42 = vld [vmem:[%s2452_s0 + $0x1d8] sm:$0xff]  ;;  %v27_v43 = vld [vmem:[%s2452_s0 + $0x60] sm:$0xff] }
  0x1c   :  { %1347 = vmatmul.mubr.msk.f32.gmra.mrb[8].mxu0 %vm108_vm0, %v1820_v27  ;;  %1395 = vmatmul.mubr.msk.f32.gmra.mrb[8].mxu1 %vm108_vm0, %v1825_v28  ;;  %v1945_v44 = vld [vmem:[%s2452_s0 + $0x1e0] sm:$0xff]  ;;  %v28_v45 = vld [vmem:[%s2452_s0 + $0x68] sm:$0xff]  ;;  %v29_v47 = vld [vmem:[%s2452_s0 + $0x70] sm:$0xff] }
  0x1d   :  { %395 = vmatprep.mubr.f32.mxu0 %v1691_v7  ;;  %683 = vmatprep.mubr.f32.mxu1 %v1691_v7  ;;  %v1958_v46 = vld [vmem:[%s2452_s0 + $0x1e8] sm:$0xff]  ;;  %v1971_v48 = vld [vmem:[%s2452_s0 + $0x1f0] sm:$0xff]  ;;  %v30_v49 = vld [vmem:[%s2452_s0 + $0x78] sm:$0xff] }
  0x1e   :  { %v1984_v50 = vld [vmem:[%s2452_s0 + $0x1f8] sm:$0xff]  ;;  %v31_v51 = vld [vmem:[%s2452_s0 + $0x80] sm:$0xff]  ;;  %v32_v52 = vld [vmem:[%s2452_s0 + $0x88] sm:$0xff] }
  0x1f   :  { %v33_v53 = vld [vmem:[%s2452_s0 + $0x90] sm:$0xff]  ;;  %v34_v54 = vld [vmem:[%s2452_s0 + $0x98] sm:$0xff]  ;;  %v35_v55 = vld [vmem:[%s2452_s0 + $0xa0] sm:$0xff] }
  0x20   :  { %1348 = vmatmul.mubr.msk.f32.gmra.mrb[10].mxu0 %vm108_vm0, %v1836_v29  ;;  %1396 = vmatmul.mubr.msk.f32.gmra.mrb[10].mxu1 %vm108_vm0, %v1841_v30  ;;  %v36_v56 = vld [vmem:[%s2452_s0 + $0xa8] sm:$0xff]  ;;  %v37_v57 = vld [vmem:[%s2452_s0 + $0xb0] sm:$0xff]  ;;  %v38_v58 = vld [vmem:[%s2452_s0 + $0xb8] sm:$0xff] }
  0x21   :  { %401 = vmatprep.mubr.f32.mxu0 %v1691_v7  ;;  %689 = vmatprep.mubr.f32.mxu1 %v1691_v7  ;;  %v39_v59 = vld [vmem:[%s2452_s0 + $0xc0] sm:$0xff]  ;;  %v40_v60 = vld [vmem:[%s2452_s0 + $0xc8] sm:$0xff]  ;;  %v41_v61 = vld [vmem:[%s2452_s0 + $0xd0] sm:$0xff] }
  0x22   :  { %v42_v62 = vld [vmem:[%s2452_s0 + $0xd8] sm:$0xff]  ;;  %v43_v63 = vld [vmem:[%s2452_s0 + $0xe0] sm:$0xff]  ;;  %v44_v0 = vld [vmem:[%s2452_s0 + $0xe8] sm:$0xff] }
  0x23   :  { %v45_v1 = vld [vmem:[%s2452_s0 + $0xf0] sm:$0xff]  ;;  %v46_v2 = vld [vmem:[%s2452_s0 + $0xf8] sm:$0xff]  ;;  %v47_v3 = vld [vmem:[%s2452_s0 + $0x100] sm:$0xff] }
  0x24   :  { %1349 = vmatmul.mubr.msk.f32.gmra.mrb[12].mxu0 %vm108_vm0, %v1852_v31  ;;  %1397 = vmatmul.mubr.msk.f32.gmra.mrb[12].mxu1 %vm108_vm0, %v1857_v32  ;;  %v48_v4 = vld [vmem:[%s2452_s0 + $0x108] sm:$0xff]  ;;  %v49_v5 = vld [vmem:[%s2452_s0 + $0x110] sm:$0xff]  ;;  %v50_v6 = vld [vmem:[%s2452_s0 + $0x118] sm:$0xff] }
  0x25   :  { %407 = vmatprep.mubr.f32.mxu0 %v1691_v7  ;;  %695 = vmatprep.mubr.f32.mxu1 %v1691_v7  ;;  %v51_v8 = vld [vmem:[%s2452_s0 + $0x120] sm:$0xff]  ;;  %v52_v9 = vld [vmem:[%s2452_s0 + $0x128] sm:$0xff]  ;;  %v53_v10 = vld [vmem:[%s2452_s0 + $0x130] sm:$0xff] }
  0x26   :  { %v54_v11 = vld [vmem:[%s2452_s0 + $0x138] sm:$0xff]  ;;  %v55_v12 = vld [vmem:[%s2452_s0 + $0x140] sm:$0xff]  ;;  %v56_v14 = vld [vmem:[%s2452_s0 + $0x148] sm:$0xff] }
  0x27   :  { %v57_v15 = vld [vmem:[%s2452_s0 + $0x150] sm:$0xff]  ;;  %v58_v19 = vld [vmem:[%s2452_s0 + $0x158] sm:$0xff]  ;;  %v91_v20 = vld [vmem:[%s2454_s2] sm:$0x7] }
  0x28   :  { %1350 = vmatmul.mubr.msk.f32.gmra.mrb[14].mxu0 %vm108_vm0, %v1868_v33  ;;  %1398 = vmatmul.mubr.msk.f32.gmra.mrb[14].mxu1 %vm108_vm0, %v1873_v34 }
  0x29   :  { %413 = vmatprep.mubr.f32.mxu0 %v1691_v7  ;;  %701 = vmatprep.mubr.f32.mxu1 %v1691_v7 }
  0x2c   :  { %1351 = vmatmul.mubr.msk.f32.gmra.mrb[16].mxu0 %vm108_vm0, %v1884_v35  ;;  %1399 = vmatmul.mubr.msk.f32.gmra.mrb[16].mxu1 %vm108_vm0, %v1889_v36 }
  0x2d   :  { %419 = vmatprep.mubr.f32.mxu0 %v1691_v7  ;;  %707 = vmatprep.mubr.f32.mxu1 %v1691_v7 }
  0x30   :  { %1352 = vmatmul.mubr.msk.f32.gmra.mrb[18].mxu0 %vm108_vm0, %v1900_v37  ;;  %1400 = vmatmul.mubr.msk.f32.gmra.mrb[18].mxu1 %vm108_vm0, %v1905_v38 }
  0x31   :  { %425 = vmatprep.mubr.f32.mxu0 %v1691_v7  ;;  %713 = vmatprep.mubr.f32.mxu1 %v1691_v7 }
  0x34   :  { %1353 = vmatmul.mubr.msk.f32.gmra.mrb[20].mxu0 %vm108_vm0, %v25_v39  ;;  %1401 = vmatmul.mubr.msk.f32.gmra.mrb[20].mxu1 %vm108_vm0, %v1919_v40 }
  0x35   :  { %431 = vmatprep.mubr.f32.mxu0 %v1691_v7  ;;  %719 = vmatprep.mubr.f32.mxu1 %v1691_v7 }
  0x38   :  { %1354 = vmatmul.mubr.msk.f32.gmra.mrb[22].mxu0 %vm108_vm0, %v26_v41  ;;  %1402 = vmatmul.mubr.msk.f32.gmra.mrb[22].mxu1 %vm108_vm0, %v1932_v42 }
  0x39   :  { %437 = vmatprep.mubr.f32.mxu0 %v1691_v7  ;;  %725 = vmatprep.mubr.f32.mxu1 %v1691_v7 }
  0x3c   :  { %1355 = vmatmul.mubr.msk.f32.gmra.mrb[24].mxu0 %vm108_vm0, %v27_v43  ;;  %1403 = vmatmul.mubr.msk.f32.gmra.mrb[24].mxu1 %vm108_vm0, %v1945_v44 }
  0x3d   :  { %443 = vmatprep.mubr.f32.mxu0 %v1691_v7  ;;  %731 = vmatprep.mubr.f32.mxu1 %v1691_v7 }
  0x40   :  { %1356 = vmatmul.mubr.msk.f32.gmra.mrb[26].mxu0 %vm108_vm0, %v28_v45  ;;  %1404 = vmatmul.mubr.msk.f32.gmra.mrb[26].mxu1 %vm108_vm0, %v1958_v46 }
  0x41   :  { %449 = vmatprep.mubr.f32.mxu0 %v1691_v7  ;;  %737 = vmatprep.mubr.f32.mxu1 %v1691_v7 }
  0x44   :  { %1357 = vmatmul.mubr.msk.f32.gmra.mrb[28].mxu0 %vm108_vm0, %v29_v47  ;;  %1405 = vmatmul.mubr.msk.f32.gmra.mrb[28].mxu1 %vm108_vm0, %v1971_v48 }
  0x45   :  { %455 = vmatprep.mubr.f32.mxu0 %v1691_v7  ;;  %743 = vmatprep.mubr.f32.mxu1 %v1691_v7 }
  0x48   :  { %1358 = vmatmul.mubr.msk.f32.gmra.mrb[30].mxu0 %vm108_vm0, %v30_v49  ;;  %1406 = vmatmul.mubr.msk.f32.gmra.mrb[30].mxu1 %vm108_vm0, %v1984_v50 }
  0x49   :  { %461 = vmatprep.mubr.f32.mxu0 %v1691_v7  ;;  %1547 = vmatprep.mubr.msk.f32.mxu1 %vm108_vm0, %v1750_v16  ;;  %v94_v16 = vshrl.u32 %v93_v13, 7 }
  0x4b   :  { %v103_v18 = vsub.s32 2, %v94_v16 }
  0x4c   :  { %1359 = vmatmul.mubr.msk.f32.gmra.mrb[32].mxu0 %vm108_vm0, %v31_v51  ;;  %1548 = vmatmul.mubr.msk.f32.vlgmr.msra.gmra.mrb[32].mxu1 %vm108_vm0, %v1771_v21  ;;  %v59_v21 = vld [vmem:[%s2452_s0 + $0x160] sm:$0xff] }
  0x4d   :  { %467 = vmatprep.mubr.f32.mxu0 %v1691_v7  ;;  %1550 = vmatprep.mubr.msk.f32.mxu1 %vm108_vm0, %v1788_v23  ;;  %v2175_v23 = vrot.slane %v91_v20, %v103_v18 }
  0x50   :  { %1360 = vmatmul.mubr.msk.f32.gmra.mrb[34].mxu0 %vm108_vm0, %v32_v52  ;;  %1551 = vmatmul.mubr.msk.f32.gmra.mrb[34].mxu1 %vm108_vm0, %v1804_v25  ;;  %v60_v25 = vld [vmem:[%s2452_s0 + $0x168] sm:$0xff] }
  0x51   :  { %473 = vmatprep.mubr.f32.mxu0 %v1691_v7  ;;  %1553 = vmatprep.mubr.msk.f32.mxu1 %vm108_vm0, %v1820_v27  ;;  %v61_v27 = vld [vmem:[%s2452_s0 + $0x170] sm:$0xff] }
  0x54   :  { %1361 = vmatmul.mubr.msk.f32.gmra.mrb[36].mxu0 %vm108_vm0, %v33_v53  ;;  %1554 = vmatmul.mubr.msk.f32.gmra.mrb[36].mxu1 %vm108_vm0, %v1836_v29  ;;  %v62_v29 = vld [vmem:[%s2452_s0 + $0x178] sm:$0xff]  ;;  %s1692_s0 = smov [#allocation2]  }
  0x55   :  { %479 = vmatprep.mubr.f32.mxu0 %v1691_v7  ;;  %1556 = vmatprep.mubr.msk.f32.mxu1 %vm108_vm0, %v1852_v31  ;;  %s1332_s25 = sshll.u32 %s1692_s0, 4  ;;  %s1333_s25 = int_to_ptr.vmem [resolvable:$true] %s1332_s25 }
  0x56   :  { %s1667_s26 = scalar_lea.vmem %s1333_s25, 24576  ;;  %p1672_p1 = scmp.lt.s32.totalorder %s1333_s25, %s1333_s25 }
  0x57   :  { %p1668_p0 = scmp.ne.s32.totalorder %s1333_s25, %s1667_s26  ;;  %p1673_p2 = scmp.lt.s32.totalorder %s1667_s26, %s1667_s26 }
  0x58   :  { %1362 = vmatmul.mubr.msk.f32.gmra.mrb[38].mxu0 %vm108_vm0, %v34_v54  ;;  %1557 = vmatmul.mubr.msk.f32.gmra.mrb[38].mxu1 %vm108_vm0, %v1868_v33 }
  0x59   :  { %485 = vmatprep.mubr.f32.mxu0 %v1691_v7  ;;  %1559 = vmatprep.mubr.msk.f32.mxu1 %vm108_vm0, %v1884_v35  ;;  %p1674_p3 = por %p1673_p2, %p1672_p1 }
  0x5b   :  { %p1675_p4 = pnand %p1674_p3, %p1668_p0 }
  0x5c   :  { %1363 = vmatmul.mubr.msk.f32.gmra.mrb[40].mxu0 %vm108_vm0, %v35_v55  ;;  %1560 = vmatmul.mubr.msk.f32.gmra.mrb[40].mxu1 %vm108_vm0, %v1900_v37 }
  0x5d   :  { %491 = vmatprep.mubr.f32.mxu0 %v1691_v7  ;;  %1562 = vmatprep.mubr.msk.f32.mxu1 %vm108_vm0, %v25_v39 }
  0x60   :  { %1364 = vmatmul.mubr.msk.f32.gmra.mrb[42].mxu0 %vm108_vm0, %v36_v56  ;;  %1563 = vmatmul.mubr.msk.f32.gmra.mrb[42].mxu1 %vm108_vm0, %v26_v41 }
  0x61   :  { %497 = vmatprep.mubr.f32.mxu0 %v1691_v7  ;;  %1565 = vmatprep.mubr.msk.f32.mxu1 %vm108_vm0, %v27_v43 }
  0x64   :  { %1365 = vmatmul.mubr.msk.f32.gmra.mrb[44].mxu0 %vm108_vm0, %v37_v57  ;;  %1566 = vmatmul.mubr.msk.f32.gmra.mrb[44].mxu1 %vm108_vm0, %v28_v45 }
  0x65   :  { %503 = vmatprep.mubr.f32.mxu0 %v1691_v7  ;;  %1568 = vmatprep.mubr.msk.f32.mxu1 %vm108_vm0, %v29_v47 }
  0x68   :  { %1366 = vmatmul.mubr.msk.f32.gmra.mrb[46].mxu0 %vm108_vm0, %v38_v58  ;;  %1569 = vmatmul.mubr.msk.f32.gmra.mrb[46].mxu1 %vm108_vm0, %v30_v49 }
  0x69   :  { %509 = vmatprep.mubr.f32.mxu0 %v1691_v7  ;;  %1571 = vmatprep.mubr.msk.f32.mxu1 %vm108_vm0, %v31_v51 }
  0x6c   :  { %1367 = vmatmul.mubr.msk.f32.gmra.mrb[48].mxu0 %vm108_vm0, %v39_v59  ;;  %1572 = vmatmul.mubr.msk.f32.gmra.mrb[48].mxu1 %vm108_vm0, %v32_v52 }
  0x6d   :  { %515 = vmatprep.mubr.f32.mxu0 %v1691_v7  ;;  %1574 = vmatprep.mubr.msk.f32.mxu1 %vm108_vm0, %v33_v53 }
  0x70   :  { %1368 = vmatmul.mubr.msk.f32.gmra.mrb[50].mxu0 %vm108_vm0, %v40_v60  ;;  %1575 = vmatmul.mubr.msk.f32.gmra.mrb[50].mxu1 %vm108_vm0, %v34_v54 }
  0x71   :  { %521 = vmatprep.mubr.f32.mxu0 %v1691_v7  ;;  %1577 = vmatprep.mubr.msk.f32.mxu1 %vm108_vm0, %v35_v55 }
  0x74   :  { %1369 = vmatmul.mubr.msk.f32.gmra.mrb[52].mxu0 %vm108_vm0, %v41_v61  ;;  %1578 = vmatmul.mubr.msk.f32.gmra.mrb[52].mxu1 %vm108_vm0, %v36_v56 }
  0x75   :  { %527 = vmatprep.mubr.f32.mxu0 %v1691_v7  ;;  %1580 = vmatprep.mubr.msk.f32.mxu1 %vm108_vm0, %v37_v57 }
  0x78   :  { %1370 = vmatmul.mubr.msk.f32.gmra.mrb[54].mxu0 %vm108_vm0, %v42_v62  ;;  %1581 = vmatmul.mubr.msk.f32.gmra.mrb[54].mxu1 %vm108_vm0, %v38_v58 }
  0x79   :  { %533 = vmatprep.mubr.f32.mxu0 %v1691_v7  ;;  %1583 = vmatprep.mubr.msk.f32.mxu1 %vm108_vm0, %v39_v59 }
  0x7c   :  { %1371 = vmatmul.mubr.msk.f32.gmra.mrb[56].mxu0 %vm108_vm0, %v43_v63  ;;  %1584 = vmatmul.mubr.msk.f32.gmra.mrb[56].mxu1 %vm108_vm0, %v40_v60 }
  0x7d   :  { %539 = vmatprep.mubr.f32.mxu0 %v1691_v7  ;;  %1586 = vmatprep.mubr.msk.f32.mxu1 %vm108_vm0, %v41_v61 }
  0x80   :  { %1372 = vmatmul.mubr.msk.f32.gmra.mrb[58].mxu0 %vm108_vm0, %v44_v0  ;;  %1587 = vmatmul.mubr.msk.f32.gmra.mrb[58].mxu1 %vm108_vm0, %v42_v62 }
  0x81   :  { %545 = vmatprep.mubr.f32.mxu0 %v1691_v7  ;;  %1589 = vmatprep.mubr.msk.f32.mxu1 %vm108_vm0, %v43_v63 }
  0x84   :  { %1373 = vmatmul.mubr.msk.f32.gmra.mrb[60].mxu0 %vm108_vm0, %v45_v1  ;;  %1590 = vmatmul.mubr.msk.f32.gmra.mrb[60].mxu1 %vm108_vm0, %v44_v0 }
  0x85   :  { %551 = vmatprep.mubr.f32.mxu0 %v1691_v7  ;;  %1592 = vmatprep.mubr.msk.f32.mxu1 %vm108_vm0, %v45_v1 }
  0x88   :  { %1374 = vmatmul.mubr.msk.f32.gmra.mrb[62].mxu0 %vm108_vm0, %v46_v2  ;;  %1593 = vmatmul.mubr.msk.f32.gmra.mrb[62].mxu1 %vm108_vm0, %v46_v2 }
  0x89   :  { %557 = vmatprep.mubr.f32.mxu0 %v1691_v7  ;;  %1595 = vmatprep.mubr.msk.f32.mxu1 %vm108_vm0, %v47_v3 }
  0x8c   :  { %1375 = vmatmul.mubr.msk.f32.gmra.mrb[64].mxu0 %vm108_vm0, %v47_v3  ;;  %1596 = vmatmul.mubr.msk.f32.gmra.mrb[64].mxu1 %vm108_vm0, %v48_v4 }
  0x8d   :  { %563 = vmatprep.mubr.f32.mxu0 %v1691_v7  ;;  %1598 = vmatprep.mubr.msk.f32.mxu1 %vm108_vm0, %v49_v5 }
  0x90   :  { %1376 = vmatmul.mubr.msk.f32.gmra.mrb[66].mxu0 %vm108_vm0, %v48_v4  ;;  %1599 = vmatmul.mubr.msk.f32.gmra.mrb[66].mxu1 %vm108_vm0, %v50_v6 }
  0x91   :  { %569 = vmatprep.mubr.f32.mxu0 %v1691_v7  ;;  %1601 = vmatprep.mubr.msk.f32.mxu1 %vm108_vm0, %v51_v8 }
  0x94   :  { %1377 = vmatmul.mubr.msk.f32.gmra.mrb[68].mxu0 %vm108_vm0, %v49_v5  ;;  %1602 = vmatmul.mubr.msk.f32.gmra.mrb[68].mxu1 %vm108_vm0, %v52_v9 }
  0x95   :  { %575 = vmatprep.mubr.f32.mxu0 %v1691_v7  ;;  %1604 = vmatprep.mubr.msk.f32.mxu1 %vm108_vm0, %v53_v10 }
  0x98   :  { %1378 = vmatmul.mubr.msk.f32.gmra.mrb[70].mxu0 %vm108_vm0, %v50_v6  ;;  %1605 = vmatmul.mubr.msk.f32.gmra.mrb[70].mxu1 %vm108_vm0, %v54_v11 }
  0x99   :  { %581 = vmatprep.mubr.f32.mxu0 %v1691_v7  ;;  %1607 = vmatprep.mubr.msk.f32.mxu1 %vm108_vm0, %v55_v12 }
  0x9c   :  { %1379 = vmatmul.mubr.msk.f32.gmra.mrb[72].mxu0 %vm108_vm0, %v51_v8  ;;  %1608 = vmatmul.mubr.msk.f32.gmra.mrb[72].mxu1 %vm108_vm0, %v56_v14 }
  0x9d   :  { %587 = vmatprep.mubr.f32.mxu0 %v1691_v7  ;;  %1610 = vmatprep.mubr.msk.f32.mxu1 %vm108_vm0, %v57_v15 }
  0xa0   :  { %1380 = vmatmul.mubr.msk.f32.gmra.mrb[74].mxu0 %vm108_vm0, %v52_v9  ;;  %1611 = vmatmul.mubr.msk.f32.gmra.mrb[74].mxu1 %vm108_vm0, %v58_v19 }
  0xa1   :  { %593 = vmatprep.mubr.f32.mxu0 %v1691_v7  ;;  %1613 = vmatprep.mubr.msk.f32.mxu1 %vm108_vm0, %v59_v21 }
  0xa4   :  { %1381 = vmatmul.mubr.msk.f32.gmra.mrb[76].mxu0 %vm108_vm0, %v53_v10  ;;  %1614 = vmatmul.mubr.msk.f32.gmra.mrb[76].mxu1 %vm108_vm0, %v60_v25 }
  0xa5   :  { %599 = vmatprep.mubr.f32.mxu0 %v1691_v7  ;;  %1616 = vmatprep.mubr.msk.f32.mxu1 %vm108_vm0, %v61_v27 }
  0xa8   :  { %1382 = vmatmul.mubr.msk.f32.gmra.mrb[78].mxu0 %vm108_vm0, %v54_v11  ;;  %1617 = vmatmul.mubr.msk.f32.gmra.mrb[78].mxu1 %vm108_vm0, %v62_v29 }
  0xa9   :  { %605 = vmatprep.mubr.f32.mxu0 %v1691_v7  ;;  %1619 = vmatprep.mubr.msk.f32.mxu1 %vm108_vm0, %v1755_v17  ;;  %v95_v17 = vsub.s32 0, %v94_v16 }
  0xac   :  { %1383 = vmatmul.mubr.msk.f32.gmra.mrb[80].mxu0 %vm108_vm0, %v55_v12  ;;  %1620 = vmatmul.mubr.msk.f32.gmra.mrb[80].mxu1 %vm108_vm0, %v1776_v22  ;;  %v99_v22 = vsub.s32 1, %v94_v16 }
  0xad   :  { %611 = vmatprep.mubr.f32.mxu0 %v1691_v7  ;;  %1622 = vmatprep.mubr.msk.f32.mxu1 %vm108_vm0, %v1793_v24  ;;  %v2244_v24 = vrot.slane %v91_v20, %v95_v17 }
  0xb0   :  { %1384 = vmatmul.mubr.msk.f32.gmra.mrb[82].mxu0 %vm108_vm0, %v56_v14  ;;  %1623 = vmatmul.mubr.msk.f32.gmra.mrb[82].mxu1 %vm108_vm0, %v1809_v26  ;;  %v2246_v26 = vrot.slane %v91_v20, %v99_v22 }
  0xb1   :  { %617 = vmatprep.mubr.f32.mxu0 %v1691_v7  ;;  %1625 = vmatprep.mubr.msk.f32.mxu1 %vm108_vm0, %v1825_v28 }
  0xb4   :  { %1385 = vmatmul.mubr.msk.f32.gmra.mrb[84].mxu0 %vm108_vm0, %v57_v15  ;;  %1626 = vmatmul.mubr.msk.f32.gmra.mrb[84].mxu1 %vm108_vm0, %v1841_v30 }
  0xb5   :  { %623 = vmatprep.mubr.f32.mxu0 %v1691_v7  ;;  %1628 = vmatprep.mubr.msk.f32.mxu1 %vm108_vm0, %v1857_v32 }
  0xb8   :  { %1386 = vmatmul.mubr.msk.f32.gmra.mrb[86].mxu0 %vm108_vm0, %v58_v19  ;;  %1629 = vmatmul.mubr.msk.f32.gmra.mrb[86].mxu1 %vm108_vm0, %v1873_v34 }
  0xb9   :  { %629 = vmatprep.mubr.f32.mxu0 %v1691_v7  ;;  %1631 = vmatprep.mubr.msk.f32.mxu1 %vm108_vm0, %v1889_v36 }
  0xbc   :  { %1387 = vmatmul.mubr.msk.f32.gmra.mrb[88].mxu0 %vm108_vm0, %v59_v21  ;;  %1632 = vmatmul.mubr.msk.f32.gmra.mrb[88].mxu1 %vm108_vm0, %v1905_v38 }
  0xbd   :  { %635 = vmatprep.mubr.f32.mxu0 %v1691_v7  ;;  %1634 = vmatprep.mubr.msk.f32.mxu1 %vm108_vm0, %v1919_v40 }
  0xc0   :  { %1388 = vmatmul.mubr.msk.f32.gmra.mrb[90].mxu0 %vm108_vm0, %v60_v25  ;;  %1635 = vmatmul.mubr.msk.f32.gmra.mrb[90].mxu1 %vm108_vm0, %v1932_v42 }
  0xc1   :  { %641 = vmatprep.mubr.f32.mxu0 %v1691_v7  ;;  %1637 = vmatprep.mubr.msk.f32.mxu1 %vm108_vm0, %v1945_v44 }
  0xc4   :  { %1389 = vmatmul.mubr.msk.f32.gmra.mrb[92].mxu0 %vm108_vm0, %v61_v27  ;;  %1638 = vmatmul.mubr.msk.f32.gmra.mrb[92].mxu1 %vm108_vm0, %v1958_v46 }
  0xc5   :  { %647 = vmatprep.mubr.f32.mxu0 %v1691_v7  ;;  %1640 = vmatprep.mubr.msk.f32.mxu1 %vm108_vm0, %v1971_v48 }
  0xc8   :  { %1390 = vmatmul.mubr.msk.f32.gmra.mrb[94].mxu0 %vm108_vm0, %v62_v29  ;;  %1641 = vmatmul.mubr.msk.f32.gmra.mrb[94].mxu1 %vm108_vm0, %v1984_v50 }
  0xdf   :  { %v367_v28 = vpop.f32.mrb[0].mxu0  ;;  %v655_v30 = vpop.f32.mrb[0].mxu1 }
  0xe0   :  { %v368_v31 = vadd.f32 %v367_v28, %v2244_v24  ;;  %v656_v7 = vadd.f32 %v655_v30, %v2244_v24  ;;  %v369_v32 = vpop.f32.mrb[1].mxu0  ;;  %v657_v33 = vpop.f32.mrb[1].mxu1 }
  0xe1   :  { %v370_v34 = vadd.f32 %v369_v32, %v2246_v26  ;;  %v658_v35 = vadd.f32 %v657_v33, %v2246_v26 }
  0xe2   :  { %1135 = vst [vmem:[#allocation2] sm:$0xff] %v368_v31  ;;  %1279 = vst [vmem:[#allocation2 + $0x480] sm:$0xff] %v656_v7 }
  0xe3   :  { %1136 = vst [vmem:[#allocation2 + $0x8] sm:$0xff] %v370_v34  ;;  %1280 = vst [vmem:[#allocation2 + $0x488] sm:$0xff] %v658_v35  ;;  %v373_v36 = vpop.f32.mrb[2].mxu0  ;;  %v661_v37 = vpop.f32.mrb[2].mxu1 }
  0xe4   :  { %v374_v38 = vadd.f32 %v373_v36, %v2244_v24  ;;  %v662_v39 = vadd.f32 %v661_v37, %v2244_v24  ;;  %v375_v40 = vpop.f32.mrb[3].mxu0  ;;  %v663_v41 = vpop.f32.mrb[3].mxu1 }
  0xe5   :  { %v376_v42 = vadd.f32 %v375_v40, %v2246_v26  ;;  %v664_v43 = vadd.f32 %v663_v41, %v2246_v26 }
  0xe6   :  { %1138 = vst [vmem:[#allocation2 + $0x18] sm:$0xff] %v374_v38  ;;  %1282 = vst [vmem:[#allocation2 + $0x498] sm:$0xff] %v662_v39 }
  0xe7   :  { %1139 = vst [vmem:[#allocation2 + $0x20] sm:$0xff] %v376_v42  ;;  %1283 = vst [vmem:[#allocation2 + $0x4a0] sm:$0xff] %v664_v43  ;;  %v379_v44 = vpop.f32.mrb[4].mxu0  ;;  %v667_v45 = vpop.f32.mrb[4].mxu1 }
  0xe8   :  { %v380_v46 = vadd.f32 %v379_v44, %v2244_v24  ;;  %v668_v47 = vadd.f32 %v667_v45, %v2244_v24  ;;  %v381_v48 = vpop.f32.mrb[5].mxu0  ;;  %v669_v49 = vpop.f32.mrb[5].mxu1 }
  0xe9   :  { %v382_v50 = vadd.f32 %v381_v48, %v2246_v26  ;;  %v670_v51 = vadd.f32 %v669_v49, %v2246_v26 }
  0xea   :  { %1141 = vst [vmem:[#allocation2 + $0x30] sm:$0xff] %v380_v46  ;;  %1285 = vst [vmem:[#allocation2 + $0x4b0] sm:$0xff] %v668_v47 }
  0xeb   :  { %1142 = vst [vmem:[#allocation2 + $0x38] sm:$0xff] %v382_v50  ;;  %1286 = vst [vmem:[#allocation2 + $0x4b8] sm:$0xff] %v670_v51  ;;  %v385_v52 = vpop.f32.mrb[6].mxu0  ;;  %v673_v53 = vpop.f32.mrb[6].mxu1 }
  0xec   :  { %v386_v54 = vadd.f32 %v385_v52, %v2244_v24  ;;  %v674_v55 = vadd.f32 %v673_v53, %v2244_v24  ;;  %v387_v56 = vpop.f32.mrb[7].mxu0  ;;  %v675_v57 = vpop.f32.mrb[7].mxu1 }
  0xed   :  { %v388_v58 = vadd.f32 %v387_v56, %v2246_v26  ;;  %v676_v59 = vadd.f32 %v675_v57, %v2246_v26 }
  0xee   :  { %1144 = vst [vmem:[#allocation2 + $0x48] sm:$0xff] %v386_v54  ;;  %1288 = vst [vmem:[#allocation2 + $0x4c8] sm:$0xff] %v674_v55 }
  0xef   :  { %1145 = vst [vmem:[#allocation2 + $0x50] sm:$0xff] %v388_v58  ;;  %1289 = vst [vmem:[#allocation2 + $0x4d0] sm:$0xff] %v676_v59  ;;  %v391_v60 = vpop.f32.mrb[8].mxu0  ;;  %v679_v61 = vpop.f32.mrb[8].mxu1 }
  0xf0   :  { %v392_v62 = vadd.f32 %v391_v60, %v2244_v24  ;;  %v680_v63 = vadd.f32 %v679_v61, %v2244_v24  ;;  %v393_v0 = vpop.f32.mrb[9].mxu0  ;;  %v681_v1 = vpop.f32.mrb[9].mxu1 }
  0xf1   :  { %v394_v2 = vadd.f32 %v393_v0, %v2246_v26  ;;  %v682_v3 = vadd.f32 %v681_v1, %v2246_v26 }
  0xf2   :  { %1147 = vst [vmem:[#allocation2 + $0x60] sm:$0xff] %v392_v62  ;;  %1291 = vst [vmem:[#allocation2 + $0x4e0] sm:$0xff] %v680_v63 }
  0xf3   :  { %1148 = vst [vmem:[#allocation2 + $0x68] sm:$0xff] %v394_v2  ;;  %1292 = vst [vmem:[#allocation2 + $0x4e8] sm:$0xff] %v682_v3  ;;  %v397_v4 = vpop.f32.mrb[10].mxu0  ;;  %v685_v5 = vpop.f32.mrb[10].mxu1 }
  0xf4   :  { %v398_v6 = vadd.f32 %v397_v4, %v2244_v24  ;;  %v686_v8 = vadd.f32 %v685_v5, %v2244_v24  ;;  %v399_v9 = vpop.f32.mrb[11].mxu0  ;;  %v687_v10 = vpop.f32.mrb[11].mxu1 }
  0xf5   :  { %v400_v11 = vadd.f32 %v399_v9, %v2246_v26  ;;  %v688_v12 = vadd.f32 %v687_v10, %v2246_v26 }
  0xf6   :  { %1150 = vst [vmem:[#allocation2 + $0x78] sm:$0xff] %v398_v6  ;;  %1294 = vst [vmem:[#allocation2 + $0x4f8] sm:$0xff] %v686_v8 }
  0xf7   :  { %1151 = vst [vmem:[#allocation2 + $0x80] sm:$0xff] %v400_v11  ;;  %1295 = vst [vmem:[#allocation2 + $0x500] sm:$0xff] %v688_v12  ;;  %v403_v13 = vpop.f32.mrb[12].mxu0  ;;  %v691_v14 = vpop.f32.mrb[12].mxu1 }
  0xf8   :  { %v404_v15 = vadd.f32 %v403_v13, %v2244_v24  ;;  %v692_v16 = vadd.f32 %v691_v14, %v2244_v24  ;;  %v405_v18 = vpop.f32.mrb[13].mxu0  ;;  %v693_v19 = vpop.f32.mrb[13].mxu1 }
  0xf9   :  { %v406_v20 = vadd.f32 %v405_v18, %v2246_v26  ;;  %v694_v21 = vadd.f32 %v693_v19, %v2246_v26 }
  0xfa   :  { %1153 = vst [vmem:[#allocation2 + $0x90] sm:$0xff] %v404_v15  ;;  %1297 = vst [vmem:[#allocation2 + $0x510] sm:$0xff] %v692_v16 }
  0xfb   :  { %1154 = vst [vmem:[#allocation2 + $0x98] sm:$0xff] %v406_v20  ;;  %1298 = vst [vmem:[#allocation2 + $0x518] sm:$0xff] %v694_v21  ;;  %v409_v25 = vpop.f32.mrb[14].mxu0  ;;  %v697_v27 = vpop.f32.mrb[14].mxu1 }
  0xfc   :  { %v410_v29 = vadd.f32 %v409_v25, %v2244_v24  ;;  %v698_v17 = vadd.f32 %v697_v27, %v2244_v24  ;;  %v411_v22 = vpop.f32.mrb[15].mxu0  ;;  %v699_v28 = vpop.f32.mrb[15].mxu1 }
  0xfd   :  { %v412_v30 = vadd.f32 %v411_v22, %v2246_v26  ;;  %v700_v31 = vadd.f32 %v699_v28, %v2246_v26 }
  0xfe   :  { %1156 = vst [vmem:[#allocation2 + $0xa8] sm:$0xff] %v410_v29  ;;  %1300 = vst [vmem:[#allocation2 + $0x528] sm:$0xff] %v698_v17 }
  0xff   :  { %1157 = vst [vmem:[#allocation2 + $0xb0] sm:$0xff] %v412_v30  ;;  %1301 = vst [vmem:[#allocation2 + $0x530] sm:$0xff] %v700_v31  ;;  %v415_v7 = vpop.f32.mrb[16].mxu0  ;;  %v703_v32 = vpop.f32.mrb[16].mxu1 }
 0x100   :  { %v416_v33 = vadd.f32 %v415_v7, %v2244_v24  ;;  %v704_v34 = vadd.f32 %v703_v32, %v2244_v24  ;;  %v417_v35 = vpop.f32.mrb[17].mxu0  ;;  %v705_v36 = vpop.f32.mrb[17].mxu1 }
 0x101   :  { %v418_v37 = vadd.f32 %v417_v35, %v2246_v26  ;;  %v706_v38 = vadd.f32 %v705_v36, %v2246_v26 }
 0x102   :  { %1159 = vst [vmem:[#allocation2 + $0xc0] sm:$0xff] %v416_v33  ;;  %1303 = vst [vmem:[#allocation2 + $0x540] sm:$0xff] %v704_v34 }
 0x103   :  { %1160 = vst [vmem:[#allocation2 + $0xc8] sm:$0xff] %v418_v37  ;;  %1304 = vst [vmem:[#allocation2 + $0x548] sm:$0xff] %v706_v38  ;;  %v421_v39 = vpop.f32.mrb[18].mxu0  ;;  %v709_v40 = vpop.f32.mrb[18].mxu1 }
 0x104   :  { %v422_v41 = vadd.f32 %v421_v39, %v2244_v24  ;;  %v710_v42 = vadd.f32 %v709_v40, %v2244_v24  ;;  %v423_v43 = vpop.f32.mrb[19].mxu0  ;;  %v711_v44 = vpop.f32.mrb[19].mxu1 }
 0x105   :  { %v424_v45 = vadd.f32 %v423_v43, %v2246_v26  ;;  %v712_v46 = vadd.f32 %v711_v44, %v2246_v26 }
 0x106   :  { %1162 = vst [vmem:[#allocation2 + $0xd8] sm:$0xff] %v422_v41  ;;  %1306 = vst [vmem:[#allocation2 + $0x558] sm:$0xff] %v710_v42 }
 0x107   :  { %1163 = vst [vmem:[#allocation2 + $0xe0] sm:$0xff] %v424_v45  ;;  %1307 = vst [vmem:[#allocation2 + $0x560] sm:$0xff] %v712_v46  ;;  %v427_v47 = vpop.f32.mrb[20].mxu0  ;;  %v715_v48 = vpop.f32.mrb[20].mxu1 }
 0x108   :  { %v428_v49 = vadd.f32 %v427_v47, %v2244_v24  ;;  %v716_v50 = vadd.f32 %v715_v48, %v2244_v24  ;;  %v429_v51 = vpop.f32.mrb[21].mxu0  ;;  %v717_v52 = vpop.f32.mrb[21].mxu1 }
 0x109   :  { %v430_v53 = vadd.f32 %v429_v51, %v2246_v26  ;;  %v718_v54 = vadd.f32 %v717_v52, %v2246_v26 }
 0x10a   :  { %1165 = vst [vmem:[#allocation2 + $0xf0] sm:$0xff] %v428_v49  ;;  %1309 = vst [vmem:[#allocation2 + $0x570] sm:$0xff] %v716_v50 }
 0x10b   :  { %1166 = vst [vmem:[#allocation2 + $0xf8] sm:$0xff] %v430_v53  ;;  %1310 = vst [vmem:[#allocation2 + $0x578] sm:$0xff] %v718_v54  ;;  %v433_v55 = vpop.f32.mrb[22].mxu0  ;;  %v721_v56 = vpop.f32.mrb[22].mxu1 }
 0x10c   :  { %v434_v57 = vadd.f32 %v433_v55, %v2244_v24  ;;  %v722_v58 = vadd.f32 %v721_v56, %v2244_v24  ;;  %v435_v59 = vpop.f32.mrb[23].mxu0  ;;  %v723_v60 = vpop.f32.mrb[23].mxu1 }
 0x10d   :  { %v436_v61 = vadd.f32 %v435_v59, %v2246_v26  ;;  %v724_v62 = vadd.f32 %v723_v60, %v2246_v26 }
 0x10e   :  { %1168 = vst [vmem:[#allocation2 + $0x108] sm:$0xff] %v434_v57  ;;  %1312 = vst [vmem:[#allocation2 + $0x588] sm:$0xff] %v722_v58 }
 0x10f   :  { %1169 = vst [vmem:[#allocation2 + $0x110] sm:$0xff] %v436_v61  ;;  %1313 = vst [vmem:[#allocation2 + $0x590] sm:$0xff] %v724_v62  ;;  %v439_v63 = vpop.f32.mrb[24].mxu0  ;;  %v727_v0 = vpop.f32.mrb[24].mxu1 }
 0x110   :  { %v440_v1 = vadd.f32 %v439_v63, %v2244_v24  ;;  %v728_v2 = vadd.f32 %v727_v0, %v2244_v24  ;;  %v441_v3 = vpop.f32.mrb[25].mxu0  ;;  %v729_v4 = vpop.f32.mrb[25].mxu1 }
 0x111   :  { %v442_v5 = vadd.f32 %v441_v3, %v2246_v26  ;;  %v730_v6 = vadd.f32 %v729_v4, %v2246_v26 }
 0x112   :  { %1171 = vst [vmem:[#allocation2 + $0x120] sm:$0xff] %v440_v1  ;;  %1315 = vst [vmem:[#allocation2 + $0x5a0] sm:$0xff] %v728_v2 }
 0x113   :  { %1172 = vst [vmem:[#allocation2 + $0x128] sm:$0xff] %v442_v5  ;;  %1316 = vst [vmem:[#allocation2 + $0x5a8] sm:$0xff] %v730_v6  ;;  %v445_v8 = vpop.f32.mrb[26].mxu0  ;;  %v733_v9 = vpop.f32.mrb[26].mxu1 }
 0x114   :  { %v446_v10 = vadd.f32 %v445_v8, %v2244_v24  ;;  %v734_v11 = vadd.f32 %v733_v9, %v2244_v24  ;;  %v447_v12 = vpop.f32.mrb[27].mxu0  ;;  %v735_v13 = vpop.f32.mrb[27].mxu1 }
 0x115   :  { %v448_v14 = vadd.f32 %v447_v12, %v2246_v26  ;;  %v736_v15 = vadd.f32 %v735_v13, %v2246_v26 }
 0x116   :  { %1174 = vst [vmem:[#allocation2 + $0x138] sm:$0xff] %v446_v10  ;;  %1318 = vst [vmem:[#allocation2 + $0x5b8] sm:$0xff] %v734_v11 }
 0x117   :  { %1175 = vst [vmem:[#allocation2 + $0x140] sm:$0xff] %v448_v14  ;;  %1319 = vst [vmem:[#allocation2 + $0x5c0] sm:$0xff] %v736_v15  ;;  %v451_v16 = vpop.f32.mrb[28].mxu0  ;;  %v739_v18 = vpop.f32.mrb[28].mxu1 }
 0x118   :  { %v452_v19 = vadd.f32 %v451_v16, %v2244_v24  ;;  %v740_v20 = vadd.f32 %v739_v18, %v2244_v24  ;;  %v453_v21 = vpop.f32.mrb[29].mxu0  ;;  %v741_v25 = vpop.f32.mrb[29].mxu1 }
 0x119   :  { %v454_v27 = vadd.f32 %v453_v21, %v2246_v26  ;;  %v742_v29 = vadd.f32 %v741_v25, %v2246_v26 }
 0x11a   :  { %1177 = vst [vmem:[#allocation2 + $0x150] sm:$0xff] %v452_v19  ;;  %1321 = vst [vmem:[#allocation2 + $0x5d0] sm:$0xff] %v740_v20 }
 0x11b   :  { %1178 = vst [vmem:[#allocation2 + $0x158] sm:$0xff] %v454_v27  ;;  %1322 = vst [vmem:[#allocation2 + $0x5d8] sm:$0xff] %v742_v29  ;;  %v457_v17 = vpop.f32.mrb[30].mxu0  ;;  %v745_v22 = vpop.f32.mrb[30].mxu1 }
 0x11c   :  { %v458_v28 = vadd.f32 %v457_v17, %v2244_v24  ;;  %v746_v30 = vadd.f32 %v745_v22, %v2244_v24  ;;  %v459_v31 = vpop.f32.mrb[31].mxu0  ;;  %v747_v7 = vpop.f32.mrb[31].mxu1 }
 0x11d   :  { %v460_v32 = vadd.f32 %v459_v31, %v2246_v26  ;;  %v748_v33 = vadd.f32 %v747_v7, %v2246_v26 }
 0x11e   :  { %1180 = vst [vmem:[#allocation2 + $0x168] sm:$0xff] %v458_v28  ;;  %1324 = vst [vmem:[#allocation2 + $0x5e8] sm:$0xff] %v746_v30 }
 0x11f   :  { %1181 = vst [vmem:[#allocation2 + $0x170] sm:$0xff] %v460_v32  ;;  %1325 = vst [vmem:[#allocation2 + $0x5f0] sm:$0xff] %v748_v33  ;;  %v463_v34 = vpop.f32.mrb[32].mxu0  ;;  %v1549_v35 = vpop.f32.mrb[32].mxu1 }
 0x120   :  { %v464_v36 = vadd.f32 %v463_v34, %v2244_v24  ;;  %v822_v37 = vadd.f32 %v1549_v35, %v2175_v23  ;;  %v465_v38 = vpop.f32.mrb[33].mxu0  ;;  %v816_v39 = vpop.f32.mrb[33].mxu1 }
 0x121   :  { %v466_v40 = vadd.f32 %v465_v38, %v2246_v26  ;;  %v817_v41 = vadd.f32 %v816_v39, %v2175_v23 }
 0x122   :  { %1183 = vst [vmem:[#allocation2 + $0x180] sm:$0xff] %v464_v36  ;;  %1140 = vst [vmem:[#allocation2 + $0x28] sm:$0xff] %v822_v37 }
 0x123   :  { %1184 = vst [vmem:[#allocation2 + $0x188] sm:$0xff] %v466_v40  ;;  %1137 = vst [vmem:[#allocation2 + $0x10] sm:$0xff] %v817_v41  ;;  %v469_v42 = vpop.f32.mrb[34].mxu0  ;;  %v1552_v43 = vpop.f32.mrb[34].mxu1 }
 0x124   :  { %v470_v44 = vadd.f32 %v469_v42, %v2244_v24  ;;  %v832_v45 = vadd.f32 %v1552_v43, %v2175_v23  ;;  %v471_v46 = vpop.f32.mrb[35].mxu0  ;;  %v826_v47 = vpop.f32.mrb[35].mxu1 }
 0x125   :  { %v472_v48 = vadd.f32 %v471_v46, %v2246_v26  ;;  %v827_v49 = vadd.f32 %v826_v47, %v2175_v23 }
 0x126   :  { %1186 = vst [vmem:[#allocation2 + $0x198] sm:$0xff] %v470_v44  ;;  %1146 = vst [vmem:[#allocation2 + $0x58] sm:$0xff] %v832_v45 }
 0x127   :  { %1187 = vst [vmem:[#allocation2 + $0x1a0] sm:$0xff] %v472_v48  ;;  %1143 = vst [vmem:[#allocation2 + $0x40] sm:$0xff] %v827_v49  ;;  %v475_v50 = vpop.f32.mrb[36].mxu0  ;;  %v1555_v51 = vpop.f32.mrb[36].mxu1 }
 0x128   :  { %v476_v52 = vadd.f32 %v475_v50, %v2244_v24  ;;  %v842_v53 = vadd.f32 %v1555_v51, %v2175_v23  ;;  %v477_v54 = vpop.f32.mrb[37].mxu0  ;;  %v836_v55 = vpop.f32.mrb[37].mxu1 }
 0x129   :  { %v478_v56 = vadd.f32 %v477_v54, %v2246_v26  ;;  %v837_v57 = vadd.f32 %v836_v55, %v2175_v23 }
 0x12a   :  { %1189 = vst [vmem:[#allocation2 + $0x1b0] sm:$0xff] %v476_v52  ;;  %1152 = vst [vmem:[#allocation2 + $0x88] sm:$0xff] %v842_v53 }
 0x12b   :  { %1190 = vst [vmem:[#allocation2 + $0x1b8] sm:$0xff] %v478_v56  ;;  %1149 = vst [vmem:[#allocation2 + $0x70] sm:$0xff] %v837_v57  ;;  %v481_v58 = vpop.f32.mrb[38].mxu0  ;;  %v1558_v59 = vpop.f32.mrb[38].mxu1 }
 0x12c   :  { %v482_v60 = vadd.f32 %v481_v58, %v2244_v24  ;;  %v852_v61 = vadd.f32 %v1558_v59, %v2175_v23  ;;  %v483_v62 = vpop.f32.mrb[39].mxu0  ;;  %v846_v63 = vpop.f32.mrb[39].mxu1 }
 0x12d   :  { %v484_v0 = vadd.f32 %v483_v62, %v2246_v26  ;;  %v847_v1 = vadd.f32 %v846_v63, %v2175_v23 }
 0x12e   :  { %1192 = vst [vmem:[#allocation2 + $0x1c8] sm:$0xff] %v482_v60  ;;  %1158 = vst [vmem:[#allocation2 + $0xb8] sm:$0xff] %v852_v61 }
 0x12f   :  { %1193 = vst [vmem:[#allocation2 + $0x1d0] sm:$0xff] %v484_v0  ;;  %1155 = vst [vmem:[#allocation2 + $0xa0] sm:$0xff] %v847_v1  ;;  %v487_v2 = vpop.f32.mrb[40].mxu0  ;;  %v1561_v3 = vpop.f32.mrb[40].mxu1 }
 0x130   :  { %v488_v4 = vadd.f32 %v487_v2, %v2244_v24  ;;  %v862_v5 = vadd.f32 %v1561_v3, %v2175_v23  ;;  %v489_v6 = vpop.f32.mrb[41].mxu0  ;;  %v856_v8 = vpop.f32.mrb[41].mxu1 }
 0x131   :  { %v490_v9 = vadd.f32 %v489_v6, %v2246_v26  ;;  %v857_v10 = vadd.f32 %v856_v8, %v2175_v23 }
 0x132   :  { %1195 = vst [vmem:[#allocation2 + $0x1e0] sm:$0xff] %v488_v4  ;;  %1164 = vst [vmem:[#allocation2 + $0xe8] sm:$0xff] %v862_v5 }
 0x133   :  { %1196 = vst [vmem:[#allocation2 + $0x1e8] sm:$0xff] %v490_v9  ;;  %1161 = vst [vmem:[#allocation2 + $0xd0] sm:$0xff] %v857_v10  ;;  %v493_v11 = vpop.f32.mrb[42].mxu0  ;;  %v1564_v12 = vpop.f32.mrb[42].mxu1 }
 0x134   :  { %v494_v13 = vadd.f32 %v493_v11, %v2244_v24  ;;  %v872_v14 = vadd.f32 %v1564_v12, %v2175_v23  ;;  %v495_v15 = vpop.f32.mrb[43].mxu0  ;;  %v866_v16 = vpop.f32.mrb[43].mxu1 }
 0x135   :  { %v496_v18 = vadd.f32 %v495_v15, %v2246_v26  ;;  %v867_v19 = vadd.f32 %v866_v16, %v2175_v23 }
 0x136   :  { %1198 = vst [vmem:[#allocation2 + $0x1f8] sm:$0xff] %v494_v13  ;;  %1170 = vst [vmem:[#allocation2 + $0x118] sm:$0xff] %v872_v14 }
 0x137   :  { %1199 = vst [vmem:[#allocation2 + $0x200] sm:$0xff] %v496_v18  ;;  %1167 = vst [vmem:[#allocation2 + $0x100] sm:$0xff] %v867_v19  ;;  %v499_v20 = vpop.f32.mrb[44].mxu0  ;;  %v1567_v21 = vpop.f32.mrb[44].mxu1 }
 0x138   :  { %v500_v25 = vadd.f32 %v499_v20, %v2244_v24  ;;  %v882_v27 = vadd.f32 %v1567_v21, %v2175_v23  ;;  %v501_v29 = vpop.f32.mrb[45].mxu0  ;;  %v876_v17 = vpop.f32.mrb[45].mxu1 }
 0x139   :  { %v502_v22 = vadd.f32 %v501_v29, %v2246_v26  ;;  %v877_v28 = vadd.f32 %v876_v17, %v2175_v23 }
 0x13a   :  { %1201 = vst [vmem:[#allocation2 + $0x210] sm:$0xff] %v500_v25  ;;  %1176 = vst [vmem:[#allocation2 + $0x148] sm:$0xff] %v882_v27 }
 0x13b   :  { %1202 = vst [vmem:[#allocation2 + $0x218] sm:$0xff] %v502_v22  ;;  %1173 = vst [vmem:[#allocation2 + $0x130] sm:$0xff] %v877_v28  ;;  %v505_v30 = vpop.f32.mrb[46].mxu0  ;;  %v1570_v31 = vpop.f32.mrb[46].mxu1 }
 0x13c   :  { %v506_v7 = vadd.f32 %v505_v30, %v2244_v24  ;;  %v892_v32 = vadd.f32 %v1570_v31, %v2175_v23  ;;  %v507_v33 = vpop.f32.mrb[47].mxu0  ;;  %v886_v34 = vpop.f32.mrb[47].mxu1 }
 0x13d   :  { %v508_v35 = vadd.f32 %v507_v33, %v2246_v26  ;;  %v887_v36 = vadd.f32 %v886_v34, %v2175_v23 }
 0x13e   :  { %1204 = vst [vmem:[#allocation2 + $0x228] sm:$0xff] %v506_v7  ;;  %1182 = vst [vmem:[#allocation2 + $0x178] sm:$0xff] %v892_v32 }
 0x13f   :  { %1205 = vst [vmem:[#allocation2 + $0x230] sm:$0xff] %v508_v35  ;;  %1179 = vst [vmem:[#allocation2 + $0x160] sm:$0xff] %v887_v36  ;;  %v511_v37 = vpop.f32.mrb[48].mxu0  ;;  %v1573_v38 = vpop.f32.mrb[48].mxu1 }
 0x140   :  { %v512_v39 = vadd.f32 %v511_v37, %v2244_v24  ;;  %v902_v40 = vadd.f32 %v1573_v38, %v2175_v23  ;;  %v513_v41 = vpop.f32.mrb[49].mxu0  ;;  %v896_v42 = vpop.f32.mrb[49].mxu1 }
 0x141   :  { %v514_v43 = vadd.f32 %v513_v41, %v2246_v26  ;;  %v897_v44 = vadd.f32 %v896_v42, %v2175_v23 }
 0x142   :  { %1207 = vst [vmem:[#allocation2 + $0x240] sm:$0xff] %v512_v39  ;;  %1188 = vst [vmem:[#allocation2 + $0x1a8] sm:$0xff] %v902_v40 }
 0x143   :  { %1208 = vst [vmem:[#allocation2 + $0x248] sm:$0xff] %v514_v43  ;;  %1185 = vst [vmem:[#allocation2 + $0x190] sm:$0xff] %v897_v44  ;;  %v517_v45 = vpop.f32.mrb[50].mxu0  ;;  %v1576_v46 = vpop.f32.mrb[50].mxu1 }
 0x144   :  { %v518_v47 = vadd.f32 %v517_v45, %v2244_v24  ;;  %v912_v48 = vadd.f32 %v1576_v46, %v2175_v23  ;;  %v519_v49 = vpop.f32.mrb[51].mxu0  ;;  %v906_v50 = vpop.f32.mrb[51].mxu1 }
 0x145   :  { %v520_v51 = vadd.f32 %v519_v49, %v2246_v26  ;;  %v907_v52 = vadd.f32 %v906_v50, %v2175_v23 }
 0x146   :  { %1210 = vst [vmem:[#allocation2 + $0x258] sm:$0xff] %v518_v47  ;;  %1194 = vst [vmem:[#allocation2 + $0x1d8] sm:$0xff] %v912_v48 }
 0x147   :  { %1211 = vst [vmem:[#allocation2 + $0x260] sm:$0xff] %v520_v51  ;;  %1191 = vst [vmem:[#allocation2 + $0x1c0] sm:$0xff] %v907_v52  ;;  %v523_v53 = vpop.f32.mrb[52].mxu0  ;;  %v1579_v54 = vpop.f32.mrb[52].mxu1 }
 0x148   :  { %v524_v55 = vadd.f32 %v523_v53, %v2244_v24  ;;  %v922_v56 = vadd.f32 %v1579_v54, %v2175_v23  ;;  %v525_v57 = vpop.f32.mrb[53].mxu0  ;;  %v916_v58 = vpop.f32.mrb[53].mxu1 }
 0x149   :  { %v526_v59 = vadd.f32 %v525_v57, %v2246_v26  ;;  %v917_v60 = vadd.f32 %v916_v58, %v2175_v23 }
 0x14a   :  { %1213 = vst [vmem:[#allocation2 + $0x270] sm:$0xff] %v524_v55  ;;  %1200 = vst [vmem:[#allocation2 + $0x208] sm:$0xff] %v922_v56 }
 0x14b   :  { %1214 = vst [vmem:[#allocation2 + $0x278] sm:$0xff] %v526_v59  ;;  %1197 = vst [vmem:[#allocation2 + $0x1f0] sm:$0xff] %v917_v60  ;;  %v529_v61 = vpop.f32.mrb[54].mxu0  ;;  %v1582_v62 = vpop.f32.mrb[54].mxu1 }
 0x14c   :  { %v530_v63 = vadd.f32 %v529_v61, %v2244_v24  ;;  %v932_v0 = vadd.f32 %v1582_v62, %v2175_v23  ;;  %v531_v1 = vpop.f32.mrb[55].mxu0  ;;  %v926_v2 = vpop.f32.mrb[55].mxu1 }
 0x14d   :  { %v532_v3 = vadd.f32 %v531_v1, %v2246_v26  ;;  %v927_v4 = vadd.f32 %v926_v2, %v2175_v23 }
 0x14e   :  { %1216 = vst [vmem:[#allocation2 + $0x288] sm:$0xff] %v530_v63  ;;  %1206 = vst [vmem:[#allocation2 + $0x238] sm:$0xff] %v932_v0 }
 0x14f   :  { %1217 = vst [vmem:[#allocation2 + $0x290] sm:$0xff] %v532_v3  ;;  %1203 = vst [vmem:[#allocation2 + $0x220] sm:$0xff] %v927_v4  ;;  %v535_v5 = vpop.f32.mrb[56].mxu0  ;;  %v1585_v6 = vpop.f32.mrb[56].mxu1 }
 0x150   :  { %v536_v8 = vadd.f32 %v535_v5, %v2244_v24  ;;  %v942_v9 = vadd.f32 %v1585_v6, %v2175_v23  ;;  %v537_v10 = vpop.f32.mrb[57].mxu0  ;;  %v936_v11 = vpop.f32.mrb[57].mxu1 }
 0x151   :  { %v538_v12 = vadd.f32 %v537_v10, %v2246_v26  ;;  %v937_v13 = vadd.f32 %v936_v11, %v2175_v23 }
 0x152   :  { %1219 = vst [vmem:[#allocation2 + $0x2a0] sm:$0xff] %v536_v8  ;;  %1212 = vst [vmem:[#allocation2 + $0x268] sm:$0xff] %v942_v9 }
 0x153   :  { %1220 = vst [vmem:[#allocation2 + $0x2a8] sm:$0xff] %v538_v12  ;;  %1209 = vst [vmem:[#allocation2 + $0x250] sm:$0xff] %v937_v13  ;;  %v541_v14 = vpop.f32.mrb[58].mxu0  ;;  %v1588_v15 = vpop.f32.mrb[58].mxu1 }
 0x154   :  { %v542_v16 = vadd.f32 %v541_v14, %v2244_v24  ;;  %v952_v18 = vadd.f32 %v1588_v15, %v2175_v23  ;;  %v543_v19 = vpop.f32.mrb[59].mxu0  ;;  %v946_v20 = vpop.f32.mrb[59].mxu1 }
 0x155   :  { %v544_v21 = vadd.f32 %v543_v19, %v2246_v26  ;;  %v947_v25 = vadd.f32 %v946_v20, %v2175_v23 }
 0x156   :  { %1222 = vst [vmem:[#allocation2 + $0x2b8] sm:$0xff] %v542_v16  ;;  %1218 = vst [vmem:[#allocation2 + $0x298] sm:$0xff] %v952_v18 }
 0x157   :  { %1223 = vst [vmem:[#allocation2 + $0x2c0] sm:$0xff] %v544_v21  ;;  %1215 = vst [vmem:[#allocation2 + $0x280] sm:$0xff] %v947_v25  ;;  %v547_v27 = vpop.f32.mrb[60].mxu0  ;;  %v1591_v29 = vpop.f32.mrb[60].mxu1 }
 0x158   :  { %v548_v17 = vadd.f32 %v547_v27, %v2244_v24  ;;  %v962_v22 = vadd.f32 %v1591_v29, %v2175_v23  ;;  %v549_v28 = vpop.f32.mrb[61].mxu0  ;;  %v956_v30 = vpop.f32.mrb[61].mxu1 }
 0x159   :  { %v550_v31 = vadd.f32 %v549_v28, %v2246_v26  ;;  %v957_v7 = vadd.f32 %v956_v30, %v2175_v23 }
 0x15a   :  { %1225 = vst [vmem:[#allocation2 + $0x2d0] sm:$0xff] %v548_v17  ;;  %1224 = vst [vmem:[#allocation2 + $0x2c8] sm:$0xff] %v962_v22 }
 0x15b   :  { %1226 = vst [vmem:[#allocation2 + $0x2d8] sm:$0xff] %v550_v31  ;;  %1221 = vst [vmem:[#allocation2 + $0x2b0] sm:$0xff] %v957_v7  ;;  %v553_v32 = vpop.f32.mrb[62].mxu0  ;;  %v1594_v33 = vpop.f32.mrb[62].mxu1 }
 0x15c   :  { %v554_v34 = vadd.f32 %v553_v32, %v2244_v24  ;;  %v972_v35 = vadd.f32 %v1594_v33, %v2175_v23  ;;  %v555_v36 = vpop.f32.mrb[63].mxu0  ;;  %v966_v37 = vpop.f32.mrb[63].mxu1 }
 0x15d   :  { %v556_v38 = vadd.f32 %v555_v36, %v2246_v26  ;;  %v967_v39 = vadd.f32 %v966_v37, %v2175_v23 }
 0x15e   :  { %1228 = vst [vmem:[#allocation2 + $0x2e8] sm:$0xff] %v554_v34  ;;  %1230 = vst [vmem:[#allocation2 + $0x2f8] sm:$0xff] %v972_v35 }
 0x15f   :  { %1229 = vst [vmem:[#allocation2 + $0x2f0] sm:$0xff] %v556_v38  ;;  %1227 = vst [vmem:[#allocation2 + $0x2e0] sm:$0xff] %v967_v39  ;;  %v559_v40 = vpop.f32.mrb[64].mxu0  ;;  %v1597_v41 = vpop.f32.mrb[64].mxu1 }
 0x160   :  { %v560_v42 = vadd.f32 %v559_v40, %v2244_v24  ;;  %v982_v43 = vadd.f32 %v1597_v41, %v2175_v23  ;;  %v561_v44 = vpop.f32.mrb[65].mxu0  ;;  %v976_v45 = vpop.f32.mrb[65].mxu1 }
 0x161   :  { %v562_v46 = vadd.f32 %v561_v44, %v2246_v26  ;;  %v977_v47 = vadd.f32 %v976_v45, %v2175_v23 }
 0x162   :  { %1231 = vst [vmem:[#allocation2 + $0x300] sm:$0xff] %v560_v42  ;;  %1236 = vst [vmem:[#allocation2 + $0x328] sm:$0xff] %v982_v43 }
 0x163   :  { %1232 = vst [vmem:[#allocation2 + $0x308] sm:$0xff] %v562_v46  ;;  %1233 = vst [vmem:[#allocation2 + $0x310] sm:$0xff] %v977_v47  ;;  %v565_v48 = vpop.f32.mrb[66].mxu0  ;;  %v1600_v49 = vpop.f32.mrb[66].mxu1 }
 0x164   :  { %v566_v50 = vadd.f32 %v565_v48, %v2244_v24  ;;  %v992_v51 = vadd.f32 %v1600_v49, %v2175_v23  ;;  %v567_v52 = vpop.f32.mrb[67].mxu0  ;;  %v986_v53 = vpop.f32.mrb[67].mxu1 }
 0x165   :  { %v568_v54 = vadd.f32 %v567_v52, %v2246_v26  ;;  %v987_v55 = vadd.f32 %v986_v53, %v2175_v23 }
 0x166   :  { %1234 = vst [vmem:[#allocation2 + $0x318] sm:$0xff] %v566_v50  ;;  %1242 = vst [vmem:[#allocation2 + $0x358] sm:$0xff] %v992_v51 }
 0x167   :  { %1235 = vst [vmem:[#allocation2 + $0x320] sm:$0xff] %v568_v54  ;;  %1239 = vst [vmem:[#allocation2 + $0x340] sm:$0xff] %v987_v55  ;;  %v571_v56 = vpop.f32.mrb[68].mxu0  ;;  %v1603_v57 = vpop.f32.mrb[68].mxu1 }
 0x168   :  { %v572_v58 = vadd.f32 %v571_v56, %v2244_v24  ;;  %v1002_v59 = vadd.f32 %v1603_v57, %v2175_v23  ;;  %v573_v60 = vpop.f32.mrb[69].mxu0  ;;  %v996_v61 = vpop.f32.mrb[69].mxu1 }
 0x169   :  { %v574_v62 = vadd.f32 %v573_v60, %v2246_v26  ;;  %v997_v63 = vadd.f32 %v996_v61, %v2175_v23 }
 0x16a   :  { %1237 = vst [vmem:[#allocation2 + $0x330] sm:$0xff] %v572_v58  ;;  %1248 = vst [vmem:[#allocation2 + $0x388] sm:$0xff] %v1002_v59 }
 0x16b   :  { %1238 = vst [vmem:[#allocation2 + $0x338] sm:$0xff] %v574_v62  ;;  %1245 = vst [vmem:[#allocation2 + $0x370] sm:$0xff] %v997_v63  ;;  %v577_v0 = vpop.f32.mrb[70].mxu0  ;;  %v1606_v1 = vpop.f32.mrb[70].mxu1 }
 0x16c   :  { %v578_v2 = vadd.f32 %v577_v0, %v2244_v24  ;;  %v1012_v3 = vadd.f32 %v1606_v1, %v2175_v23  ;;  %v579_v4 = vpop.f32.mrb[71].mxu0  ;;  %v1006_v5 = vpop.f32.mrb[71].mxu1 }
 0x16d   :  { %v580_v6 = vadd.f32 %v579_v4, %v2246_v26  ;;  %v1007_v8 = vadd.f32 %v1006_v5, %v2175_v23 }
 0x16e   :  { %1240 = vst [vmem:[#allocation2 + $0x348] sm:$0xff] %v578_v2  ;;  %1254 = vst [vmem:[#allocation2 + $0x3b8] sm:$0xff] %v1012_v3 }
 0x16f   :  { %1241 = vst [vmem:[#allocation2 + $0x350] sm:$0xff] %v580_v6  ;;  %1251 = vst [vmem:[#allocation2 + $0x3a0] sm:$0xff] %v1007_v8  ;;  %v583_v9 = vpop.f32.mrb[72].mxu0  ;;  %v1609_v10 = vpop.f32.mrb[72].mxu1 }
 0x170   :  { %v584_v11 = vadd.f32 %v583_v9, %v2244_v24  ;;  %v1022_v12 = vadd.f32 %v1609_v10, %v2175_v23  ;;  %v585_v13 = vpop.f32.mrb[73].mxu0  ;;  %v1016_v14 = vpop.f32.mrb[73].mxu1 }
 0x171   :  { %v586_v15 = vadd.f32 %v585_v13, %v2246_v26  ;;  %v1017_v16 = vadd.f32 %v1016_v14, %v2175_v23 }
 0x172   :  { %1243 = vst [vmem:[#allocation2 + $0x360] sm:$0xff] %v584_v11  ;;  %1260 = vst [vmem:[#allocation2 + $0x3e8] sm:$0xff] %v1022_v12 }
 0x173   :  { %1244 = vst [vmem:[#allocation2 + $0x368] sm:$0xff] %v586_v15  ;;  %1257 = vst [vmem:[#allocation2 + $0x3d0] sm:$0xff] %v1017_v16  ;;  %v589_v18 = vpop.f32.mrb[74].mxu0  ;;  %v1612_v19 = vpop.f32.mrb[74].mxu1 }
 0x174   :  { %v590_v20 = vadd.f32 %v589_v18, %v2244_v24  ;;  %v1032_v21 = vadd.f32 %v1612_v19, %v2175_v23  ;;  %v591_v25 = vpop.f32.mrb[75].mxu0  ;;  %v1026_v27 = vpop.f32.mrb[75].mxu1 }
 0x175   :  { %v592_v29 = vadd.f32 %v591_v25, %v2246_v26  ;;  %v1027_v17 = vadd.f32 %v1026_v27, %v2175_v23 }
 0x176   :  { %1246 = vst [vmem:[#allocation2 + $0x378] sm:$0xff] %v590_v20  ;;  %1266 = vst [vmem:[#allocation2 + $0x418] sm:$0xff] %v1032_v21 }
 0x177   :  { %1247 = vst [vmem:[#allocation2 + $0x380] sm:$0xff] %v592_v29  ;;  %1263 = vst [vmem:[#allocation2 + $0x400] sm:$0xff] %v1027_v17  ;;  %v595_v22 = vpop.f32.mrb[76].mxu0  ;;  %v1615_v28 = vpop.f32.mrb[76].mxu1 }
 0x178   :  { %v596_v30 = vadd.f32 %v595_v22, %v2244_v24  ;;  %v1042_v31 = vadd.f32 %v1615_v28, %v2175_v23  ;;  %v597_v7 = vpop.f32.mrb[77].mxu0  ;;  %v1036_v32 = vpop.f32.mrb[77].mxu1 }
 0x179   :  { %v598_v33 = vadd.f32 %v597_v7, %v2246_v26  ;;  %v1037_v34 = vadd.f32 %v1036_v32, %v2175_v23 }
 0x17a   :  { %1249 = vst [vmem:[#allocation2 + $0x390] sm:$0xff] %v596_v30  ;;  %1272 = vst [vmem:[#allocation2 + $0x448] sm:$0xff] %v1042_v31 }
 0x17b   :  { %1250 = vst [vmem:[#allocation2 + $0x398] sm:$0xff] %v598_v33  ;;  %1269 = vst [vmem:[#allocation2 + $0x430] sm:$0xff] %v1037_v34  ;;  %v601_v35 = vpop.f32.mrb[78].mxu0  ;;  %v1618_v36 = vpop.f32.mrb[78].mxu1 }
 0x17c   :  { %v602_v37 = vadd.f32 %v601_v35, %v2244_v24  ;;  %v1052_v38 = vadd.f32 %v1618_v36, %v2175_v23  ;;  %v603_v39 = vpop.f32.mrb[79].mxu0  ;;  %v1046_v40 = vpop.f32.mrb[79].mxu1 }
 0x17d   :  { %v604_v41 = vadd.f32 %v603_v39, %v2246_v26  ;;  %v1047_v42 = vadd.f32 %v1046_v40, %v2175_v23 }
 0x17e   :  { %1252 = vst [vmem:[#allocation2 + $0x3a8] sm:$0xff] %v602_v37  ;;  %1278 = vst [vmem:[#allocation2 + $0x478] sm:$0xff] %v1052_v38 }
 0x17f   :  { %1253 = vst [vmem:[#allocation2 + $0x3b0] sm:$0xff] %v604_v41  ;;  %1275 = vst [vmem:[#allocation2 + $0x460] sm:$0xff] %v1047_v42  ;;  %v607_v43 = vpop.f32.mrb[80].mxu0  ;;  %v1621_v44 = vpop.f32.mrb[80].mxu1 }
 0x180   :  { %v608_v45 = vadd.f32 %v607_v43, %v2244_v24  ;;  %v1062_v46 = vadd.f32 %v1621_v44, %v2175_v23  ;;  %v609_v47 = vpop.f32.mrb[81].mxu0  ;;  %v1056_v48 = vpop.f32.mrb[81].mxu1 }
 0x181   :  { %v610_v49 = vadd.f32 %v609_v47, %v2246_v26  ;;  %v1057_v50 = vadd.f32 %v1056_v48, %v2175_v23 }
 0x182   :  { %1255 = vst [vmem:[#allocation2 + $0x3c0] sm:$0xff] %v608_v45  ;;  %1284 = vst [vmem:[#allocation2 + $0x4a8] sm:$0xff] %v1062_v46 }
 0x183   :  { %1256 = vst [vmem:[#allocation2 + $0x3c8] sm:$0xff] %v610_v49  ;;  %1281 = vst [vmem:[#allocation2 + $0x490] sm:$0xff] %v1057_v50  ;;  %v613_v51 = vpop.f32.mrb[82].mxu0  ;;  %v1624_v52 = vpop.f32.mrb[82].mxu1 }
 0x184   :  { %v614_v53 = vadd.f32 %v613_v51, %v2244_v24  ;;  %v1072_v54 = vadd.f32 %v1624_v52, %v2175_v23  ;;  %v615_v55 = vpop.f32.mrb[83].mxu0  ;;  %v1066_v56 = vpop.f32.mrb[83].mxu1 }
 0x185   :  { %v616_v57 = vadd.f32 %v615_v55, %v2246_v26  ;;  %v1067_v58 = vadd.f32 %v1066_v56, %v2175_v23 }
 0x186   :  { %1258 = vst [vmem:[#allocation2 + $0x3d8] sm:$0xff] %v614_v53  ;;  %1290 = vst [vmem:[#allocation2 + $0x4d8] sm:$0xff] %v1072_v54 }
 0x187   :  { %1259 = vst [vmem:[#allocation2 + $0x3e0] sm:$0xff] %v616_v57  ;;  %1287 = vst [vmem:[#allocation2 + $0x4c0] sm:$0xff] %v1067_v58  ;;  %v619_v59 = vpop.f32.mrb[84].mxu0  ;;  %v1627_v60 = vpop.f32.mrb[84].mxu1 }
 0x188   :  { %v620_v61 = vadd.f32 %v619_v59, %v2244_v24  ;;  %v1082_v62 = vadd.f32 %v1627_v60, %v2175_v23  ;;  %v621_v63 = vpop.f32.mrb[85].mxu0  ;;  %v1076_v0 = vpop.f32.mrb[85].mxu1 }
 0x189   :  { %v622_v1 = vadd.f32 %v621_v63, %v2246_v26  ;;  %v1077_v2 = vadd.f32 %v1076_v0, %v2175_v23 }
 0x18a   :  { %1261 = vst [vmem:[#allocation2 + $0x3f0] sm:$0xff] %v620_v61  ;;  %1296 = vst [vmem:[#allocation2 + $0x508] sm:$0xff] %v1082_v62 }
 0x18b   :  { %1262 = vst [vmem:[#allocation2 + $0x3f8] sm:$0xff] %v622_v1  ;;  %1293 = vst [vmem:[#allocation2 + $0x4f0] sm:$0xff] %v1077_v2  ;;  %v625_v3 = vpop.f32.mrb[86].mxu0  ;;  %v1630_v4 = vpop.f32.mrb[86].mxu1 }
 0x18c   :  { %v626_v5 = vadd.f32 %v625_v3, %v2244_v24  ;;  %v1092_v6 = vadd.f32 %v1630_v4, %v2175_v23  ;;  %v627_v8 = vpop.f32.mrb[87].mxu0  ;;  %v1086_v9 = vpop.f32.mrb[87].mxu1 }
 0x18d   :  { %v628_v10 = vadd.f32 %v627_v8, %v2246_v26  ;;  %v1087_v11 = vadd.f32 %v1086_v9, %v2175_v23 }
 0x18e   :  { %1264 = vst [vmem:[#allocation2 + $0x408] sm:$0xff] %v626_v5  ;;  %1302 = vst [vmem:[#allocation2 + $0x538] sm:$0xff] %v1092_v6 }
 0x18f   :  { %1265 = vst [vmem:[#allocation2 + $0x410] sm:$0xff] %v628_v10  ;;  %1299 = vst [vmem:[#allocation2 + $0x520] sm:$0xff] %v1087_v11  ;;  %v631_v12 = vpop.f32.mrb[88].mxu0  ;;  %v1633_v13 = vpop.f32.mrb[88].mxu1 }
 0x190   :  { %v632_v14 = vadd.f32 %v631_v12, %v2244_v24  ;;  %v1102_v15 = vadd.f32 %v1633_v13, %v2175_v23  ;;  %v633_v16 = vpop.f32.mrb[89].mxu0  ;;  %v1096_v18 = vpop.f32.mrb[89].mxu1 }
 0x191   :  { %v634_v19 = vadd.f32 %v633_v16, %v2246_v26  ;;  %v1097_v20 = vadd.f32 %v1096_v18, %v2175_v23 }
 0x192   :  { %1267 = vst [vmem:[#allocation2 + $0x420] sm:$0xff] %v632_v14  ;;  %1308 = vst [vmem:[#allocation2 + $0x568] sm:$0xff] %v1102_v15 }
 0x193   :  { %1268 = vst [vmem:[#allocation2 + $0x428] sm:$0xff] %v634_v19  ;;  %1305 = vst [vmem:[#allocation2 + $0x550] sm:$0xff] %v1097_v20  ;;  %v637_v21 = vpop.f32.mrb[90].mxu0  ;;  %v1636_v25 = vpop.f32.mrb[90].mxu1 }
 0x194   :  { %v638_v27 = vadd.f32 %v637_v21, %v2244_v24  ;;  %v1112_v29 = vadd.f32 %v1636_v25, %v2175_v23  ;;  %v639_v17 = vpop.f32.mrb[91].mxu0  ;;  %v1106_v22 = vpop.f32.mrb[91].mxu1 }
 0x195   :  { %v640_v28 = vadd.f32 %v639_v17, %v2246_v26  ;;  %v1107_v30 = vadd.f32 %v1106_v22, %v2175_v23 }
 0x196   :  { %1270 = vst [vmem:[#allocation2 + $0x438] sm:$0xff] %v638_v27  ;;  %1314 = vst [vmem:[#allocation2 + $0x598] sm:$0xff] %v1112_v29 }
 0x197   :  { %1271 = vst [vmem:[#allocation2 + $0x440] sm:$0xff] %v640_v28  ;;  %1311 = vst [vmem:[#allocation2 + $0x580] sm:$0xff] %v1107_v30  ;;  %v643_v31 = vpop.f32.mrb[92].mxu0  ;;  %v1639_v7 = vpop.f32.mrb[92].mxu1 }
 0x198   :  { %v644_v32 = vadd.f32 %v643_v31, %v2244_v24  ;;  %v1122_v33 = vadd.f32 %v1639_v7, %v2175_v23  ;;  %v645_v34 = vpop.f32.mrb[93].mxu0  ;;  %v1116_v35 = vpop.f32.mrb[93].mxu1 }
 0x199   :  { %v646_v36 = vadd.f32 %v645_v34, %v2246_v26  ;;  %v1117_v37 = vadd.f32 %v1116_v35, %v2175_v23 }
 0x19a   :  { %1273 = vst [vmem:[#allocation2 + $0x450] sm:$0xff] %v644_v32  ;;  %1320 = vst [vmem:[#allocation2 + $0x5c8] sm:$0xff] %v1122_v33 }
 0x19b   :  { %1274 = vst [vmem:[#allocation2 + $0x458] sm:$0xff] %v646_v36  ;;  %1317 = vst [vmem:[#allocation2 + $0x5b0] sm:$0xff] %v1117_v37  ;;  %v649_v38 = vpop.f32.mrb[94].mxu0  ;;  %v1642_v39 = vpop.f32.mrb[94].mxu1 }
 0x19c   :  { %v650_v40 = vadd.f32 %v649_v38, %v2244_v24  ;;  %v1132_v41 = vadd.f32 %v1642_v39, %v2175_v23  ;;  %v651_v42 = vpop.f32.mrb[95].mxu0  ;;  %v1126_v43 = vpop.f32.mrb[95].mxu1 }
 0x19d   :  { %v652_v44 = vadd.f32 %v651_v42, %v2246_v26  ;;  %v1127_v45 = vadd.f32 %v1126_v43, %v2175_v23 }
 0x19e   :  { %1276 = vst [vmem:[#allocation2 + $0x468] sm:$0xff] %v650_v40  ;;  %1326 = vst [vmem:[#allocation2 + $0x5f8] sm:$0xff] %v1132_v41 }
 0x19f   :  { %1277 = vst [vmem:[#allocation2 + $0x470] sm:$0xff] %v652_v44  ;;  %1323 = vst [vmem:[#allocation2 + $0x5e0] sm:$0xff] %v1127_v45 }
 0x1a0   :  { %1678 = shalt.err (!%p1675_p4)
}
 0x1a1   :  { %s1679_s29 = scalar_lea.hbm %s2455_s3, 24576 }
 0x1a2   :  { %p1680_p5 = scmp.ne.s32.totalorder %s2455_s3, %s1679_s29  ;;  %p1683_p6 = scmp.lt.u32.totalorder %s1679_s29, %s2455_s3 }
 0x1a4   :  { %p1685_p7 = pnand %p1683_p6, %p1680_p5 }
 0x1a6   :  { %1688 = shalt.err (!%p1685_p7)
}
 0x1a7   :  { %s1693_s7 = smov 384   ;;  %s1694_s8 = smov 24  }
 0x1a8   :  { %1338 = dma.vmem_to_hbm [thread:$0]  %s1333_s25, 24576, %s2455_s3, [#allocation3], %s1693_s7, %s1693_s7, %s1694_s8  }
 0x1a9   :  { %1689 = dma.done.wait [#allocation3], 24576  }
 0x1aa   :  { %1690 = vsyncadd [#allocation3], 4294942720 }
 0x1ab   :  { %1342 = vsyncpa [#allocation3], 1 }

</bundles_post_ra>
